<compile_context>
chip_gen: v6e
topology: v6e:2x2x1
jax: 0.10.0
libtpu: 0.0.40
codegen_flags: <defaults>
</compile_context>

<pallas_src>
import jax
import jax.numpy as jnp
from jax.experimental import pallas as pl
from jax.experimental.pallas import tpu as pltpu

D_IN = 784            # 28 * 28
D_H = 400             # 20 ** 2
D_HP = 512            # hidden dim zero-padded to a lane multiple (exact)
D_ENC = 40            # 20 * 2
D_Z = 20
D_HEADS = 2 * D_Z     # packed [mu | logvar]
D_HEADS_PAD = 128     # heads output lane-padded for a dense store


def vae_fwd_kernel(x_ref, eps_ref,
                   w1_ref, b1_ref, wh_ref, bh_ref,
                   wd1_ref, bd1_ref, wd2_ref, bd2_ref,
                   recon_ref, heads_ref):
    # x arrives f32 straight from HBM; cast to bf16 in VMEM for the MXU.
    x = x_ref[...].astype(jnp.bfloat16)

    # encoder Linear(784 -> 512pad) + ReLU (bf16 MXU, f32 accumulate)
    h = jnp.dot(x, w1_ref[...], preferred_element_type=jnp.float32) + b1_ref[...]
    h = jnp.maximum(h, 0.0)

    # encoder Linear(400 -> 40) folded with fc_mu / fc_logvar (exact fold, no nonlinearity
    # between), lane-padded to 128 output columns (extra columns are exactly zero).
    heads = jnp.dot(h.astype(jnp.bfloat16), wh_ref[...],
                    preferred_element_type=jnp.float32) + bh_ref[...]
    mu = heads[:, :D_Z]
    logvar = heads[:, D_Z:D_HEADS]

    # reparameterise: z = eps * exp(0.5 * logvar) + mu
    z = eps_ref[...] * jnp.exp(0.5 * logvar) + mu

    # decoder Linear(20 -> 512pad) + ReLU
    hd = jnp.dot(z.astype(jnp.bfloat16), wd1_ref[...],
                 preferred_element_type=jnp.float32) + bd1_ref[...]
    hd = jnp.maximum(hd, 0.0)

    # decoder Linear(400 -> 784) + exact Sigmoid (exp overflow -> 1/inf = 0, which is correct)
    logits = jnp.dot(hd.astype(jnp.bfloat16), wd2_ref[...],
                     preferred_element_type=jnp.float32) + bd2_ref[...]
    recon_ref[...] = (1.0 / (1.0 + jnp.exp(-logits))).astype(recon_ref.dtype)
    heads_ref[...] = heads


def init_params(key):
    """Deterministic init; nn.Linear(out, in) weights stored transposed as (in, out)."""
    def linear(key, d_in, d_out):
        k_w, k_b = jax.random.split(key)
        bound = 1.0 / jnp.sqrt(d_in)
        w = jax.random.uniform(k_w, (d_in, d_out), jnp.float32, -bound, bound)
        b = jax.random.uniform(k_b, (1, d_out), jnp.float32, -bound, bound)
        return w, b

    keys = jax.random.split(key, 6)
    p = {}
    p["w1"], p["b1"] = linear(keys[0], D_IN, D_H)      # encoder[0]
    p["w2"], p["b2"] = linear(keys[1], D_H, D_ENC)     # encoder[2]
    p["wmu"], p["bmu"] = linear(keys[2], D_ENC, D_Z)   # fc_mu
    p["wlv"], p["blv"] = linear(keys[3], D_ENC, D_Z)   # fc_logvar
    p["wd1"], p["bd1"] = linear(keys[4], D_Z, D_H)     # decoder[0]
    p["wd2"], p["bd2"] = linear(keys[5], D_H, D_IN)    # decoder[2]
    return p


def prepare_params(p):
    """Fold mu/logvar heads into encoder[2] (in f32), pad hidden 400->512 and heads 40->128,
    cast matmul weights to bf16 (biases stay f32 for the f32 accumulate)."""
    w_cat = jnp.concatenate([p["wmu"], p["wlv"]], axis=1)                           # (40, 40)
    w_heads = p["w2"] @ w_cat                                                       # (400, 40)
    b_heads = p["b2"] @ w_cat + jnp.concatenate([p["bmu"], p["blv"]], axis=1)       # (1, 40)

    hpad = D_HP - D_H
    lpad = D_HEADS_PAD - D_HEADS
    w1p = jnp.pad(p["w1"], ((0, 0), (0, hpad)))             # (784, 512)
    b1p = jnp.pad(p["b1"], ((0, 0), (0, hpad)))             # (1, 512)
    whp = jnp.pad(w_heads, ((0, hpad), (0, lpad)))          # (512, 128)
    bhp = jnp.pad(b_heads, ((0, 0), (0, lpad)))             # (1, 128)
    wd1p = jnp.pad(p["wd1"], ((0, 0), (0, hpad)))           # (20, 512)
    bd1p = jnp.pad(p["bd1"], ((0, 0), (0, hpad)))           # (1, 512)
    wd2p = jnp.pad(p["wd2"], ((0, hpad), (0, 0)))           # (512, 784)

    bf = jnp.bfloat16
    return dict(
        w1=w1p.astype(bf), b1=b1p,
        wh=whp.astype(bf), bh=bhp,
        wd1=wd1p.astype(bf), bd1=bd1p,
        wd2=wd2p.astype(bf), bd2=p["bd2"],
    )


def vae_forward(image, eps, kp, *, batch_tile=512):
    """image: (B, 1, 28, 28) float32; eps: (B, 20) float32 standard-normal sample.

    Returns (construction [bf16], mu [f32], logvar [f32])."""
    B = image.shape[0]
    x = image.reshape(B, D_IN)                 # layout-free; stays f32, cast in-kernel
    eps = eps.astype(jnp.float32)

    # batch tile: multiple of 8 sublanes, capped at batch_tile, and chosen so the grid has
    # at least 2 steps (v7x: both TensorCores get work; also enables x/recon double-buffering).
    half = -(-B // 2)                                     # ceil(B / 2)
    tb = min(batch_tile, max(8, ((half + 7) // 8) * 8))
    n_steps = max(2, -(-B // tb))
    b_pad = n_steps * tb
    if b_pad != B:
        x = jnp.pad(x, ((0, b_pad - B), (0, 0)))
        eps = jnp.pad(eps, ((0, b_pad - B), (0, 0)))

    grid = (n_steps,)

    def batch_spec(d):
        return pl.BlockSpec((tb, d), lambda i: (i, 0))

    def const_spec(shape):
        return pl.BlockSpec(shape, lambda i: (0, 0))   # resident across grid steps

    recon, heads = pl.pallas_call(
        vae_fwd_kernel,
        grid=grid,
        out_shape=(
            jax.ShapeDtypeStruct((b_pad, D_IN), jnp.bfloat16),        # construction
            jax.ShapeDtypeStruct((b_pad, D_HEADS_PAD), jnp.float32),  # packed [mu|logvar|0pad]
        ),
        in_specs=[
            batch_spec(D_IN),                 # x (f32)
            batch_spec(D_Z),                  # eps
            const_spec((D_IN, D_HP)),         # w1
            const_spec((1, D_HP)),            # b1
            const_spec((D_HP, D_HEADS_PAD)),  # w_heads (encoder[2] ∘ heads, folded)
            const_spec((1, D_HEADS_PAD)),     # b_heads
            const_spec((D_Z, D_HP)),          # wd1
            const_spec((1, D_HP)),            # bd1
            const_spec((D_HP, D_IN)),         # wd2
            const_spec((1, D_IN)),            # bd2
        ],
        out_specs=(batch_spec(D_IN), batch_spec(D_HEADS_PAD)),
        compiler_params=pltpu.CompilerParams(
            dimension_semantics=("parallel",),        # split batch across TCs on v7x
            vmem_limit_bytes=48 * 1024 * 1024,        # big tiles fit on v5e's scoped VMEM too
        ),
    )(x, eps, kp["w1"], kp["b1"], kp["wh"], kp["bh"],
      kp["wd1"], kp["bd1"], kp["wd2"], kp["bd2"])

    recon = recon[:B]
    mu = heads[:B, :D_Z]
    logvar = heads[:B, D_Z:D_HEADS]
    return recon, mu, logvar


if __name__ == "__main__":
    key = jax.random.PRNGKey(0)
    k_params, k_img, k_eps = jax.random.split(key, 3)

    params = init_params(k_params)
    kparams = prepare_params(params)

    B = 4
    image = jax.random.uniform(k_img, (B, 1, 28, 28), jnp.float32)   # NCHW like PyTorch
    eps = jax.random.normal(k_eps, (B, D_Z), jnp.float32)            # reparameterisation noise

    recon, mu, logvar = jax.block_until_ready(vae_forward(image, eps, kparams))

    # pure-JAX f32 reference (unfolded, unpadded) for correctness
    x32 = image.reshape(B, D_IN)
    h = jnp.maximum(x32 @ params["w1"] + params["b1"], 0.0)
    enc = h @ params["w2"] + params["b2"]
    mu_ref = enc @ params["wmu"] + params["bmu"]
    lv_ref = enc @ params["wlv"] + params["blv"]
    z = eps * jnp.exp(0.5 * lv_ref) + mu_ref
    hd = jnp.maximum(z @ params["wd1"] + params["bd1"], 0.0)
    recon_ref = jax.nn.sigmoid(hd @ params["wd2"] + params["bd2"])

    recon_f32 = recon.astype(jnp.float32)
    assert recon.shape == (B, D_IN)
    assert mu.shape == (B, D_Z)
    assert logvar.shape == (B, D_Z)
    assert bool(jnp.all(jnp.isfinite(recon_f32)))
    assert float(jnp.max(jnp.abs(recon_f32 - recon_ref))) < 4e-2   # bf16 weights + bf16 output
    assert float(jnp.max(jnp.abs(mu - mu_ref))) < 3e-2
    assert float(jnp.max(jnp.abs(logvar - lv_ref))) < 3e-2

    print("KERNEL_OK")
</pallas_src>

<mosaic_0001>
module attributes {stable_mosaic.version = 11 : i64} {
  func.func @vae_fwd_kernel(%arg0: i32, %arg1: memref<8x784xf32, #tpu.memory_space<vmem>>, %arg2: memref<8x20xf32, #tpu.memory_space<vmem>>, %arg3: memref<784x512xbf16, #tpu.memory_space<vmem>>, %arg4: memref<1x512xf32, #tpu.memory_space<vmem>>, %arg5: memref<512x128xbf16, #tpu.memory_space<vmem>>, %arg6: memref<1x128xf32, #tpu.memory_space<vmem>>, %arg7: memref<20x512xbf16, #tpu.memory_space<vmem>>, %arg8: memref<1x512xf32, #tpu.memory_space<vmem>>, %arg9: memref<512x784xbf16, #tpu.memory_space<vmem>>, %arg10: memref<1x784xf32, #tpu.memory_space<vmem>>, %arg11: memref<8x784xbf16, #tpu.memory_space<vmem>>, %arg12: memref<8x128xf32, #tpu.memory_space<vmem>>) attributes {dimension_semantics = [#tpu.dimension_semantics<parallel>], iteration_bounds = array<i64: 2>, scalar_prefetch = 0 : i64, scratch_operands = 0 : i64, tpu.core_type = #tpu.core_type<tc>, window_params = [{transform_indices = @transform_0, window_bounds = array<i64: 8, 784>}, {transform_indices = @transform_1, window_bounds = array<i64: 8, 20>}, {pipeline_mode = #tpu.pipeline_mode<synchronous>, transform_indices = @transform_2, window_bounds = array<i64: 784, 512>}, {pipeline_mode = #tpu.pipeline_mode<synchronous>, transform_indices = @transform_3, window_bounds = array<i64: 1, 512>}, {pipeline_mode = #tpu.pipeline_mode<synchronous>, transform_indices = @transform_4, window_bounds = array<i64: 512, 128>}, {pipeline_mode = #tpu.pipeline_mode<synchronous>, transform_indices = @transform_5, window_bounds = array<i64: 1, 128>}, {pipeline_mode = #tpu.pipeline_mode<synchronous>, transform_indices = @transform_6, window_bounds = array<i64: 20, 512>}, {pipeline_mode = #tpu.pipeline_mode<synchronous>, transform_indices = @transform_7, window_bounds = array<i64: 1, 512>}, {pipeline_mode = #tpu.pipeline_mode<synchronous>, transform_indices = @transform_8, window_bounds = array<i64: 512, 784>}, {pipeline_mode = #tpu.pipeline_mode<synchronous>, transform_indices = @transform_9, window_bounds = array<i64: 1, 784>}, {transform_indices = @transform_10, window_bounds = array<i64: 8, 784>}, {transform_indices = @transform_11, window_bounds = array<i64: 8, 128>}]} {
    %c0 = arith.constant 0 : index
    %c0_0 = arith.constant 0 : index
    %0 = vector.load %arg1[%c0, %c0_0] : memref<8x784xf32, #tpu.memory_space<vmem>>, vector<8x784xf32>
    %1 = arith.truncf %0 : vector<8x784xf32> to vector<8x784xbf16>
    %c0_1 = arith.constant 0 : index
    %c0_2 = arith.constant 0 : index
    %2 = vector.load %arg3[%c0_1, %c0_2] : memref<784x512xbf16, #tpu.memory_space<vmem>>, vector<784x512xbf16>
    %cst = arith.constant dense<0.000000e+00> : vector<8x512xf32>
    %3 = tpu.matmul %1, %2, %cst {dimension_numbers = #tpu.dot_dimension_numbers<[1], [0], [0], [1], [0, 0, 1, 1], [], []>} : vector<8x784xbf16>, vector<784x512xbf16>, vector<8x512xf32> -> vector<8x512xf32>
    %c0_3 = arith.constant 0 : index
    %c0_4 = arith.constant 0 : index
    %4 = vector.load %arg4[%c0_3, %c0_4] : memref<1x512xf32, #tpu.memory_space<vmem>>, vector<1x512xf32>
    %5 = vector.broadcast %4 : vector<1x512xf32> to vector<8x512xf32>
    %6 = arith.addf %3, %5 : vector<8x512xf32>
    %cst_5 = arith.constant 0.000000e+00 : f32
    %7 = vector.broadcast %cst_5 : f32 to vector<8x512xf32>
    %8 = arith.maximumf %6, %7 : vector<8x512xf32>
    %9 = arith.truncf %8 : vector<8x512xf32> to vector<8x512xbf16>
    %c0_6 = arith.constant 0 : index
    %c0_7 = arith.constant 0 : index
    %10 = vector.load %arg5[%c0_6, %c0_7] : memref<512x128xbf16, #tpu.memory_space<vmem>>, vector<512x128xbf16>
    %cst_8 = arith.constant dense<0.000000e+00> : vector<8x128xf32>
    %11 = tpu.matmul %9, %10, %cst_8 {dimension_numbers = #tpu.dot_dimension_numbers<[1], [0], [0], [1], [0, 0, 1, 1], [], []>} : vector<8x512xbf16>, vector<512x128xbf16>, vector<8x128xf32> -> vector<8x128xf32>
    %c0_9 = arith.constant 0 : index
    %c0_10 = arith.constant 0 : index
    %12 = vector.load %arg6[%c0_9, %c0_10] : memref<1x128xf32, #tpu.memory_space<vmem>>, vector<1x128xf32>
    %13 = vector.broadcast %12 : vector<1x128xf32> to vector<8x128xf32>
    %14 = arith.addf %11, %13 : vector<8x128xf32>
    %15 = vector.extract_strided_slice %14 {offsets = [0, 0], sizes = [8, 20], strides = [1, 1]} : vector<8x128xf32> to vector<8x20xf32>
    %16 = vector.extract_strided_slice %14 {offsets = [0, 20], sizes = [8, 20], strides = [1, 1]} : vector<8x128xf32> to vector<8x20xf32>
    %c0_11 = arith.constant 0 : index
    %c0_12 = arith.constant 0 : index
    %17 = vector.load %arg2[%c0_11, %c0_12] : memref<8x20xf32, #tpu.memory_space<vmem>>, vector<8x20xf32>
    %cst_13 = arith.constant 5.000000e-01 : f32
    %18 = vector.broadcast %cst_13 : f32 to vector<8x20xf32>
    %19 = arith.mulf %18, %16 : vector<8x20xf32>
    %20 = math.exp %19 : vector<8x20xf32>
    %21 = arith.mulf %17, %20 : vector<8x20xf32>
    %22 = arith.addf %21, %15 : vector<8x20xf32>
    %23 = arith.truncf %22 : vector<8x20xf32> to vector<8x20xbf16>
    %c0_14 = arith.constant 0 : index
    %c0_15 = arith.constant 0 : index
    %24 = vector.load %arg7[%c0_14, %c0_15] : memref<20x512xbf16, #tpu.memory_space<vmem>>, vector<20x512xbf16>
    %cst_16 = arith.constant dense<0.000000e+00> : vector<8x512xf32>
    %25 = tpu.matmul %23, %24, %cst_16 {dimension_numbers = #tpu.dot_dimension_numbers<[1], [0], [0], [1], [0, 0, 1, 1], [], []>} : vector<8x20xbf16>, vector<20x512xbf16>, vector<8x512xf32> -> vector<8x512xf32>
    %c0_17 = arith.constant 0 : index
    %c0_18 = arith.constant 0 : index
    %26 = vector.load %arg8[%c0_17, %c0_18] : memref<1x512xf32, #tpu.memory_space<vmem>>, vector<1x512xf32>
    %27 = vector.broadcast %26 : vector<1x512xf32> to vector<8x512xf32>
    %28 = arith.addf %25, %27 : vector<8x512xf32>
    %cst_19 = arith.constant 0.000000e+00 : f32
    %29 = vector.broadcast %cst_19 : f32 to vector<8x512xf32>
    %30 = arith.maximumf %28, %29 : vector<8x512xf32>
    %31 = arith.truncf %30 : vector<8x512xf32> to vector<8x512xbf16>
    %c0_20 = arith.constant 0 : index
    %c0_21 = arith.constant 0 : index
    %32 = vector.load %arg9[%c0_20, %c0_21] : memref<512x784xbf16, #tpu.memory_space<vmem>>, vector<512x784xbf16>
    %cst_22 = arith.constant dense<0.000000e+00> : vector<8x784xf32>
    %33 = tpu.matmul %31, %32, %cst_22 {dimension_numbers = #tpu.dot_dimension_numbers<[1], [0], [0], [1], [0, 0, 1, 1], [], []>} : vector<8x512xbf16>, vector<512x784xbf16>, vector<8x784xf32> -> vector<8x784xf32>
    %c0_23 = arith.constant 0 : index
    %c0_24 = arith.constant 0 : index
    %34 = vector.load %arg10[%c0_23, %c0_24] : memref<1x784xf32, #tpu.memory_space<vmem>>, vector<1x784xf32>
    %35 = vector.broadcast %34 : vector<1x784xf32> to vector<8x784xf32>
    %36 = arith.addf %33, %35 : vector<8x784xf32>
    %cst_25 = arith.constant 0.000000e+00 : f32
    %37 = vector.broadcast %cst_25 : f32 to vector<8x784xf32>
    %38 = arith.subf %37, %36 : vector<8x784xf32>
    %39 = math.exp %38 : vector<8x784xf32>
    %cst_26 = arith.constant 1.000000e+00 : f32
    %40 = vector.broadcast %cst_26 : f32 to vector<8x784xf32>
    %41 = arith.addf %40, %39 : vector<8x784xf32>
    %cst_27 = arith.constant 1.000000e+00 : f32
    %42 = vector.broadcast %cst_27 : f32 to vector<8x784xf32>
    %43 = arith.divf %42, %41 : vector<8x784xf32>
    %44 = arith.truncf %43 : vector<8x784xf32> to vector<8x784xbf16>
    %c0_28 = arith.constant 0 : index
    %c0_29 = arith.constant 0 : index
    %45 = vector.load %arg11[%c0_28, %c0_29] : memref<8x784xbf16, #tpu.memory_space<vmem>>, vector<8x784xbf16>
    tpu.vector_store %arg11[%c0_28, %c0_29], %44 {strides = array<i32>} : memref<8x784xbf16, #tpu.memory_space<vmem>>, vector<8x784xbf16>,
    %c0_30 = arith.constant 0 : index
    %c0_31 = arith.constant 0 : index
    %46 = vector.load %arg12[%c0_30, %c0_31] : memref<8x128xf32, #tpu.memory_space<vmem>>, vector<8x128xf32>
    tpu.vector_store %arg12[%c0_30, %c0_31], %14 {strides = array<i32>} : memref<8x128xf32, #tpu.memory_space<vmem>>, vector<8x128xf32>,
    return
  }
  func.func @transform_0(%arg0: i32) -> (i32, i32) {
    %c0_i32 = arith.constant 0 : i32
    %c0_i32_0 = arith.constant 0 : i32
    return %arg0, %c0_i32 : i32, i32
  }
  func.func @transform_1(%arg0: i32) -> (i32, i32) {
    %c0_i32 = arith.constant 0 : i32
    %c0_i32_0 = arith.constant 0 : i32
    return %arg0, %c0_i32 : i32, i32
  }
  func.func @transform_2(%arg0: i32) -> (i32, i32) {
    %c0_i32 = arith.constant 0 : i32
    %c0_i32_0 = arith.constant 0 : i32
    %c0_i32_1 = arith.constant 0 : i32
    return %c0_i32, %c0_i32_0 : i32, i32
  }
  func.func @transform_3(%arg0: i32) -> (i32, i32) {
    %c0_i32 = arith.constant 0 : i32
    %c0_i32_0 = arith.constant 0 : i32
    %c0_i32_1 = arith.constant 0 : i32
    return %c0_i32, %c0_i32_0 : i32, i32
  }
  func.func @transform_4(%arg0: i32) -> (i32, i32) {
    %c0_i32 = arith.constant 0 : i32
    %c0_i32_0 = arith.constant 0 : i32
    %c0_i32_1 = arith.constant 0 : i32
    return %c0_i32, %c0_i32_0 : i32, i32
  }
  func.func @transform_5(%arg0: i32) -> (i32, i32) {
    %c0_i32 = arith.constant 0 : i32
    %c0_i32_0 = arith.constant 0 : i32
    %c0_i32_1 = arith.constant 0 : i32
    return %c0_i32, %c0_i32_0 : i32, i32
  }
  func.func @transform_6(%arg0: i32) -> (i32, i32) {
    %c0_i32 = arith.constant 0 : i32
    %c0_i32_0 = arith.constant 0 : i32
    %c0_i32_1 = arith.constant 0 : i32
    return %c0_i32, %c0_i32_0 : i32, i32
  }
  func.func @transform_7(%arg0: i32) -> (i32, i32) {
    %c0_i32 = arith.constant 0 : i32
    %c0_i32_0 = arith.constant 0 : i32
    %c0_i32_1 = arith.constant 0 : i32
    return %c0_i32, %c0_i32_0 : i32, i32
  }
  func.func @transform_8(%arg0: i32) -> (i32, i32) {
    %c0_i32 = arith.constant 0 : i32
    %c0_i32_0 = arith.constant 0 : i32
    %c0_i32_1 = arith.constant 0 : i32
    return %c0_i32, %c0_i32_0 : i32, i32
  }
  func.func @transform_9(%arg0: i32) -> (i32, i32) {
    %c0_i32 = arith.constant 0 : i32
    %c0_i32_0 = arith.constant 0 : i32
    %c0_i32_1 = arith.constant 0 : i32
    return %c0_i32, %c0_i32_0 : i32, i32
  }
  func.func @transform_10(%arg0: i32) -> (i32, i32) {
    %c0_i32 = arith.constant 0 : i32
    %c0_i32_0 = arith.constant 0 : i32
    return %arg0, %c0_i32 : i32, i32
  }
  func.func @transform_11(%arg0: i32) -> (i32, i32) {
    %c0_i32 = arith.constant 0 : i32
    %c0_i32_0 = arith.constant 0 : i32
    return %arg0, %c0_i32 : i32, i32
  }
}

</mosaic_0001>

<bundles_post_ra>
// kernel: tpu_custom_call.1
= control target key start
LH: loop header
LB: loop body
LE: loop exit
PB: predicated region body
PF: predicated region fallthrough
CT: control target
= control target key end

     0   :  { %s7557_s0 = inlined_call_operand.vmem [shape: f32[16,784], index: 0, kind: input, shape index: {}]   ;;  %s7558_s1 = inlined_call_operand.vmem [shape: f32[16,20], index: 1, kind: input, shape index: {}]   ;;  %s7559_s2 = inlined_call_operand.vmem [shape: bf16[784,512], index: 2, kind: input, shape index: {}]   ;;  %s7560_s3 = inlined_call_operand.vmem [shape: f32[1,512], index: 3, kind: input, shape index: {}]   ;;  %s7561_s4 = inlined_call_operand.vmem [shape: bf16[512,128], index: 4, kind: input, shape index: {}]   ;;  %s7562_s5 = inlined_call_operand.vmem [shape: f32[1,128], index: 5, kind: input, shape index: {}]   ;;  %s7563_s6 = inlined_call_operand.vmem [shape: bf16[20,512], index: 6, kind: input, shape index: {}]   ;;  %s7564_s7 = inlined_call_operand.vmem [shape: f32[1,512], index: 7, kind: input, shape index: {}]   ;;  %s7565_s8 = inlined_call_operand.vmem [shape: bf16[512,784], index: 8, kind: input, shape index: {}]   ;;  %s7566_s9 = inlined_call_operand.vmem [shape: f32[1,784], index: 9, kind: input, shape index: {}]   ;;  %s7567_s10 = inlined_call_operand.hbm [shape: bf16[16,784], index: 10, kind: output, shape index: {0}]   ;;  %s7568_s11 = inlined_call_operand.hbm [shape: f32[16,128], index: 11, kind: output, shape index: {1}]  }
   0x1   :  { %7572 = sst [smem:[#allocation11_spill]] %s7557_s0 }
   0x2   :  { %7573 = sst [smem:[#allocation12_spill]] %s7558_s1 }
   0x3   :  { %17 = vsyncpa [#allocation3], 0 }
   0x4   :  { %19 = vsyncpa [#allocation3 + $0x1], 0 }
   0x5   :  { %20 = vsyncpa [#allocation5], 0 }
   0x6   :  { %22 = vsyncpa [#allocation5 + $0x1], 0  ;;  %s5935_s17 = smov 0   ;;  %s5937_s18 = smov 0  }
   0x7   :  { %s5939_s19 = smov 0   ;;  %s5941_s20 = smov 0  }
   0x8 LB: > { %7574 = sst [smem:[#allocation8_spill]] %s5865_s19  ;;  %s5956_s21 = sadd.s32 4294967295, %s5869_s20   ;;  %s5869_s20 = sphi %s5941_s20, %s7581_s20   ;;  %s5865_s19 = sphi %s5939_s19, %s7583_s19   ;;  %s5861_s18 = sphi %s5937_s18, %s7585_s18   ;;  %s5857_s17 = sphi %s5935_s17, %s7584_s17  }
   0x9   : > { %s4469_s22 = sadd.s32 4294967294, %s5869_s20   ;;  %s5960_s23 = sadd.s32 1, %s5869_s20  }
   0xa   : > { %7575 = sst [smem:[#allocation9_spill]] %s5960_s23  ;;  %s255_s24 = sadd.s32 1, %s5865_s19 }
   0xb   : > { %s252_s25 = ssub.s32 %s5869_s20, %s5960_s23  ;;  %p265_p0 = scmp.ne.s32.totalorder %s5865_s19, %s5861_s18 }
   0xc   : > { %p253_p1 = scmp.eq.s32.totalorder %s252_s25, 0  ;;  %p266_p2 = scmp.eq.s32.totalorder %s5956_s21, 1 }
   0xd   : > { %p271_p3 = scmp.ne.s32.totalorder %s5861_s18, %s5857_s17  ;;  %p272_p4 = scmp.eq.s32.totalorder %s4469_s22, 1 }
   0xe   : > { %s5971_s26 = scalar_select %p253_p1, %s5865_s19, %s255_s24  }
   0xf   : > { %p5973_p5 = por %p266_p2, %p265_p0  ;;  %p5977_p6 = por %p272_p4, %p271_p3 }
  0x10   : > { %7576 = sst [smem:[#allocation10_spill]] %s5971_s26  ;;  %p4472_p7 = scmp.ge.s32.totalorder %s5869_s20, 1 }
  0x11   : > { %p355_p8 = scmp.lt.s32.totalorder %s5869_s20, 3 }
  0x13   : > { %p356_p9 = pnand %p4472_p7, %p355_p8 }
  0x14   : > { %p404_p10 = scmp.lt.s32.totalorder (!%p356_p9), %s5956_s21, 1  ;;  %s7579_s0 = sld [smem:[#allocation11_spill]] (!%p356_p9) }
  0x15   : > { %359 = sbr.rel (%p356_p9) target bundleno = 1382 (0x566), region = 60  ;;  %s6748_s16 = sand.u32 (!%p356_p9), 1, %s5861_s18  }
  0x16   : > { %s5872_s26 = smov (!%p356_p9), 108   ;;  %s7580_s1 = sld [smem:[#allocation12_spill]] (!%p356_p9) }
  0x17   : > { %s5044_s14 = smul.u32 (!%p356_p9), 28, %s6748_s16  ;;  %s4339_s30 = scalar_lea.sflag (!%p356_p9), [#allocation5], %s6748_s16 }
  0x19   : > { %s7488_s15 = scalar_lea.vmem (!%p356_p9), [#allocation2], %s5044_s14 }
  0x1a   : > { %v5093_v0 = vld [vmem:[%s7559_s2 + $0xe4] ss:$16 sps:$4 sm:$0xff]   ;;  %v5097_v2 = vld [vmem:[%s7559_s2 + $0xe0] ss:$16 sps:$4 sm:$0xff]   ;;  %s6093_s12 = scalar_select %p404_p10, %s5956_s21, 1  ;;  %vm1626_vm0 = vcmask 130048  }
  0x1b   : > { %v5095_v1 = vld [vmem:[%s7559_s2 + $0x2e4] ss:$16 sps:$4 sm:$0xff]   ;;  %1630 = vmatprep.subr.bf16.mxu0 %v5093_v0  ;;  %v5098_v3 = vld [vmem:[%s7559_s2 + $0x2e0] ss:$16 sps:$4 sm:$0xff]   ;;  %vm2382_vm1 = vcmask 1041408   ;;  %vm2378_vm2 = vcmask 162816  }
  0x1c   : > { %1671 = vmatprep.subr.bf16.mxu1 %v5095_v1  ;;  %v5099_v4 = vld [vmem:[%s7559_s2 + $0xc4] ss:$16 sps:$4 sm:$0xff]   ;;  %1631 = vmatpush1.bf16.msra.mxu0 %v5097_v2  ;;  %v5103_v6 = vld [vmem:[%s7559_s2 + $0xc0] ss:$16 sps:$4 sm:$0xff]   ;;  %s5045_s25 = smul.u32 56, %s6093_s12  ;;  %s4475_s13 = sshll.u32 %s6093_s12, 3 }
  0x1d   : > { %1672 = vmatpush1.bf16.msra.mxu1 %v5098_v3  ;;  %v5101_v5 = vld [vmem:[%s7559_s2 + $0x2c4] ss:$16 sps:$4 sm:$0xff]   ;;  %1632 = vmatprep.subr.bf16.mxu0 %v5099_v4  ;;  %v5104_v7 = vld [vmem:[%s7559_s2 + $0x2c0] ss:$16 sps:$4 sm:$0xff]   ;;  %s412_s19 = scalar_lea.vmem %s7580_s1, %s4475_s13 }
  0x1e   : > { %1673 = vmatprep.subr.bf16.mxu1 %v5101_v5  ;;  %v5105_v8 = vld [vmem:[%s7559_s2 + $0xa4] ss:$16 sps:$4 sm:$0xff]   ;;  %v5109_v10 = vld [vmem:[%s7559_s2 + $0xa0] ss:$16 sps:$4 sm:$0xff]   ;;  %s6123_s23 = scalar_lea.vmem %s7579_s0, %s5045_s25 }
  0x1f   : > { %v5107_v9 = vld [vmem:[%s7559_s2 + $0x2a4] ss:$16 sps:$4 sm:$0xff]   ;;  %v5110_v11 = vld [vmem:[%s7559_s2 + $0x2a0] ss:$16 sps:$4 sm:$0xff]   ;;  %v415_v46 = vld [vmem:[%s6123_s23 + $0x8] sm:$0xff] }
  0x20   : > { %1633 = vmatpush1.bf16.msra.mxu0 %v5103_v6  ;;  %v5111_v12 = vld [vmem:[%s7559_s2 + $0x84] ss:$16 sps:$4 sm:$0xff]   ;;  %v5115_v14 = vld [vmem:[%s7559_s2 + $0x80] ss:$16 sps:$4 sm:$0xff]   ;;  %v6138_v49 = vpack.c.bf16 %v415_v46, %v415_v46  ;;  %v417_v50 = vld [vmem:[%s6123_s23 + $0x18] sm:$0xff] }
  0x21   : > { %1674 = vmatpush1.bf16.msra.mxu1 %v5104_v7  ;;  %1634 = vmatprep.subr.bf16.mxu0 %v5105_v8  ;;  %v5113_v13 = vld [vmem:[%s7559_s2 + $0x284] ss:$16 sps:$4 sm:$0xff]   ;;  %v5116_v15 = vld [vmem:[%s7559_s2 + $0x280] ss:$16 sps:$4 sm:$0xff]   ;;  %v6144_v52 = vpack.c.bf16 %v417_v50, %v417_v50 }
  0x22   : > { %1675 = vmatprep.subr.bf16.mxu1 %v5107_v9  ;;  %v5117_v16 = vld [vmem:[%s7559_s2 + $0x64] ss:$16 sps:$4 sm:$0xff]   ;;  %v5121_v18 = vld [vmem:[%s7559_s2 + $0x60] ss:$16 sps:$4 sm:$0xff]   ;;  %1662 = vmatprep.mubr.bf16.mxu0 %v6138_v49 }
  0x23   : > { %v5119_v17 = vld [vmem:[%s7559_s2 + $0x264] ss:$16 sps:$4 sm:$0xff]   ;;  %v5122_v19 = vld [vmem:[%s7559_s2 + $0x260] ss:$16 sps:$4 sm:$0xff]   ;;  %1703 = vmatprep.mubr.bf16.mxu1 %v6144_v52 }
  0x24   : > { %1635 = vmatpush1.bf16.msra.mxu0 %v5109_v10  ;;  %v5123_v20 = vld [vmem:[%s7559_s2 + $0x44] ss:$16 sps:$4 sm:$0xff]   ;;  %v5127_v22 = vld [vmem:[%s7559_s2 + $0x40] ss:$16 sps:$4 sm:$0xff]  }
  0x25   : > { %1676 = vmatpush1.bf16.msra.mxu1 %v5110_v11  ;;  %1636 = vmatprep.subr.bf16.mxu0 %v5111_v12  ;;  %v5125_v21 = vld [vmem:[%s7559_s2 + $0x244] ss:$16 sps:$4 sm:$0xff]   ;;  %v5128_v23 = vld [vmem:[%s7559_s2 + $0x240] ss:$16 sps:$4 sm:$0xff]  }
  0x26   : > { %1677 = vmatprep.subr.bf16.mxu1 %v5113_v13  ;;  %v5129_v24 = vld [vmem:[%s7559_s2 + $0x24] ss:$16 sps:$4 sm:$0xff]   ;;  %v5133_v26 = vld [vmem:[%s7559_s2 + $0x20] ss:$16 sps:$4 sm:$0xff]   ;;  %v5200_v13 = vld [vmem:[%s7559_s2 + $0xec] ss:$16 sps:$4 sm:$0xff]  }
  0x27   : > { %v5131_v25 = vld [vmem:[%s7559_s2 + $0x224] ss:$16 sps:$4 sm:$0xff]   ;;  %v5134_v27 = vld [vmem:[%s7559_s2 + $0x220] ss:$16 sps:$4 sm:$0xff]  }
  0x28   : > { %1637 = vmatpush1.bf16.msra.mxu0 %v5115_v14  ;;  %v5135_v28 = vld [vmem:[%s7559_s2 + $0x4] ss:$16 sps:$4 sm:$0xff]   ;;  %v5139_v30 = vld [vmem:[%s7559_s2] ss:$16 sps:$4 sm:$0xff]  }
  0x29   : > { %1678 = vmatpush1.bf16.msra.mxu1 %v5116_v15  ;;  %1638 = vmatprep.subr.bf16.mxu0 %v5117_v16  ;;  %v5137_v29 = vld [vmem:[%s7559_s2 + $0x204] ss:$16 sps:$4 sm:$0xff]   ;;  %v5140_v31 = vld [vmem:[%s7559_s2 + $0x200] ss:$16 sps:$4 sm:$0xff]   ;;  %v5871_v16 = vmov 0  }
  0x2a   : > { %1679 = vmatprep.subr.bf16.mxu1 %v5119_v17  ;;  %v5141_v32 = vld [vmem:[%s7559_s2 + $0x1e4] ss:$16 sps:$4 sm:$0xff]   ;;  %v5145_v34 = vld [vmem:[%s7559_s2 + $0x1e0] ss:$16 sps:$4 sm:$0xff]  }
  0x2b   : > { %v5143_v33 = vld [vmem:[%s7559_s2 + $0x3e4] ss:$16 sps:$4 sm:$0xff]   ;;  %v5146_v35 = vld [vmem:[%s7559_s2 + $0x3e0] ss:$16 sps:$4 sm:$0xff]  }
  0x2c   : > { %1639 = vmatpush1.bf16.msra.mxu0 %v5121_v18  ;;  %v5147_v36 = vld [vmem:[%s7559_s2 + $0x1c4] ss:$16 sps:$4 sm:$0xff]   ;;  %v5151_v38 = vld [vmem:[%s7559_s2 + $0x1c0] ss:$16 sps:$4 sm:$0xff]   ;;  %v5198_v18 = vld [vmem:[%s7559_s2 + $0xe8] ss:$16 sps:$4 sm:$0xff]  }
  0x2d   : > { %1680 = vmatpush1.bf16.msra.mxu1 %v5122_v19  ;;  %1640 = vmatprep.subr.bf16.mxu0 %v5123_v20  ;;  %v5149_v37 = vld [vmem:[%s7559_s2 + $0x3c4] ss:$16 sps:$4 sm:$0xff]   ;;  %v5152_v39 = vld [vmem:[%s7559_s2 + $0x3c0] ss:$16 sps:$4 sm:$0xff]  }
  0x2e   : > { %1681 = vmatprep.subr.bf16.mxu1 %v5125_v21  ;;  %v5153_v40 = vld [vmem:[%s7559_s2 + $0x1a4] ss:$16 sps:$4 sm:$0xff]   ;;  %v5157_v42 = vld [vmem:[%s7559_s2 + $0x1a0] ss:$16 sps:$4 sm:$0xff]   ;;  %v5206_v21 = vld [vmem:[%s7559_s2 + $0xcc] ss:$16 sps:$4 sm:$0xff]  }
  0x2f   : > { %v5155_v41 = vld [vmem:[%s7559_s2 + $0x3a4] ss:$16 sps:$4 sm:$0xff]   ;;  %v5158_v43 = vld [vmem:[%s7559_s2 + $0x3a0] ss:$16 sps:$4 sm:$0xff]  }
  0x30   : > { %1641 = vmatpush1.bf16.msra.mxu0 %v5127_v22  ;;  %v5159_v44 = vld [vmem:[%s7559_s2 + $0x184] ss:$16 sps:$4 sm:$0xff]   ;;  %v5163_v47 = vld [vmem:[%s7559_s2 + $0x180] ss:$16 sps:$4 sm:$0xff]  }
  0x31   : > { %1682 = vmatpush1.bf16.msra.mxu1 %v5128_v23  ;;  %1642 = vmatprep.subr.bf16.mxu0 %v5129_v24  ;;  %v5161_v45 = vld [vmem:[%s7559_s2 + $0x384] ss:$16 sps:$4 sm:$0xff]   ;;  %v5164_v48 = vld [vmem:[%s7559_s2 + $0x380] ss:$16 sps:$4 sm:$0xff]   ;;  %v5204_v23 = vld [vmem:[%s7559_s2 + $0xc8] ss:$16 sps:$4 sm:$0xff]  }
  0x32   : > { %1683 = vmatprep.subr.bf16.mxu1 %v5131_v25  ;;  %v5165_v51 = vld [vmem:[%s7559_s2 + $0x164] ss:$16 sps:$4 sm:$0xff]   ;;  %v5169_v54 = vld [vmem:[%s7559_s2 + $0x160] ss:$16 sps:$4 sm:$0xff]   ;;  %v5212_v25 = vld [vmem:[%s7559_s2 + $0xac] ss:$16 sps:$4 sm:$0xff]  }
  0x33   : > { %v5167_v53 = vld [vmem:[%s7559_s2 + $0x364] ss:$16 sps:$4 sm:$0xff]   ;;  %v5170_v55 = vld [vmem:[%s7559_s2 + $0x360] ss:$16 sps:$4 sm:$0xff]  }
  0x34   : > { %1643 = vmatpush1.bf16.msra.mxu0 %v5133_v26  ;;  %v5171_v56 = vld [vmem:[%s7559_s2 + $0x144] ss:$16 sps:$4 sm:$0xff]   ;;  %v5175_v58 = vld [vmem:[%s7559_s2 + $0x140] ss:$16 sps:$4 sm:$0xff]  }
  0x35   : > { %1684 = vmatpush1.bf16.msra.mxu1 %v5134_v27  ;;  %1644 = vmatprep.subr.bf16.mxu0 %v5135_v28  ;;  %v5173_v57 = vld [vmem:[%s7559_s2 + $0x344] ss:$16 sps:$4 sm:$0xff]   ;;  %v5176_v59 = vld [vmem:[%s7559_s2 + $0x340] ss:$16 sps:$4 sm:$0xff]   ;;  %v5210_v27 = vld [vmem:[%s7559_s2 + $0xa8] ss:$16 sps:$4 sm:$0xff]  }
  0x36   : > { %1685 = vmatprep.subr.bf16.mxu1 %v5137_v29  ;;  %v5177_v60 = vld [vmem:[%s7559_s2 + $0x124] ss:$16 sps:$4 sm:$0xff]   ;;  %v5181_v62 = vld [vmem:[%s7559_s2 + $0x120] ss:$16 sps:$4 sm:$0xff]   ;;  %v5218_v29 = vld [vmem:[%s7559_s2 + $0x8c] ss:$16 sps:$4 sm:$0xff]  }
  0x37   : > { %v5179_v61 = vld [vmem:[%s7559_s2 + $0x324] ss:$16 sps:$4 sm:$0xff]   ;;  %v5182_v63 = vld [vmem:[%s7559_s2 + $0x320] ss:$16 sps:$4 sm:$0xff]  }
  0x38   : > { %1645 = vmatpush1.bf16.msra.mxu0 %v5139_v30  ;;  %v5183_v0 = vld [vmem:[%s7559_s2 + $0x104] ss:$16 sps:$4 sm:$0xff]   ;;  %v5187_v2 = vld [vmem:[%s7559_s2 + $0x100] ss:$16 sps:$4 sm:$0xff]  }
  0x39   : > { %1686 = vmatpush1.bf16.msra.mxu1 %v5140_v31  ;;  %1646 = vmatprep.subr.bf16.mxu0 %v5141_v32  ;;  %v5185_v1 = vld [vmem:[%s7559_s2 + $0x304] ss:$16 sps:$4 sm:$0xff]   ;;  %v5188_v3 = vld [vmem:[%s7559_s2 + $0x300] ss:$16 sps:$4 sm:$0xff]   ;;  %v5216_v31 = vld [vmem:[%s7559_s2 + $0x88] ss:$16 sps:$4 sm:$0xff]  }
  0x3a   : > { %1687 = vmatprep.subr.bf16.mxu1 %v5143_v33  ;;  %v414_v4 = vld [vmem:[%s6123_s23] sm:$0xff]  ;;  %v416_v5 = vld [vmem:[%s6123_s23 + $0x10] sm:$0xff]  ;;  %v5224_v33 = vld [vmem:[%s7559_s2 + $0x6c] ss:$16 sps:$4 sm:$0xff]  }
  0x3b   : > { %v5191_v6 = vld [vmem:[%s7559_s2 + $0x4e4] ss:$16 sps:$4 sm:$0xff]   ;;  %v6201_v8 = vpack.c.bf16 %v414_v4, %v414_v4  ;;  %v6203_v9 = vpack.c.bf16 %v416_v5, %v416_v5  ;;  %v5189_v10 = vld [vmem:[%s7559_s2 + $0x4e0] ss:$16 sps:$4 sm:$0xff]   ;;  %v5272_v4 = vld [vmem:[%s7559_s2 + $0x16c] ss:$16 sps:$4 sm:$0xff]  }
  0x3c   : > { %1647 = vmatpush2.bf16.msra.mxu0 %v5145_v34  ;;  %v5194_v7 = vld [vmem:[%s7559_s2 + $0x604] ss:$16 sps:$4 sm:$0xff]   ;;  %v5192_v11 = vld [vmem:[%s7559_s2 + $0x600] ss:$16 sps:$4 sm:$0xff]  }
  0x3d   : > { %1688 = vmatpush2.bf16.msra.mxu1 %v5146_v35  ;;  %1648 = vmatprep.subr.bf16.mxu0 %v5147_v36  ;;  %v5197_v12 = vld [vmem:[%s7559_s2 + $0x4c4] ss:$16 sps:$4 sm:$0xff]   ;;  %v5195_v14 = vld [vmem:[%s7559_s2 + $0x4c0] ss:$16 sps:$4 sm:$0xff]   ;;  %v419_v35 = vld [vmem:[%s6123_s23 + $0x28] sm:$0xff] }
  0x3e   : > { %1689 = vmatprep.subr.bf16.mxu1 %v5149_v37  ;;  %v420_v15 = vld [vmem:[%s6123_s23 + $0x30] sm:$0xff]  ;;  %v6281_v36 = vpack.c.bf16 %v419_v35, %v419_v35  ;;  %v5222_v37 = vld [vmem:[%s7559_s2 + $0x68] ss:$16 sps:$4 sm:$0xff]  }
  0x3f   : > { %v5203_v17 = vld [vmem:[%s7559_s2 + $0x4a4] ss:$16 sps:$4 sm:$0xff]   ;;  %v6230_v19 = vpack.c.bf16 %v420_v15, %v420_v15  ;;  %v5201_v20 = vld [vmem:[%s7559_s2 + $0x4a0] ss:$16 sps:$4 sm:$0xff]   ;;  %v5306_v35 = vld [vmem:[%s7559_s2 + $0x4a8] ss:$16 sps:$4 sm:$0xff]  }
  0x40   : > { %1649 = vmatpush2.bf16.msra.mxu0 %v5151_v38  ;;  %v5209_v22 = vld [vmem:[%s7559_s2 + $0x484] ss:$16 sps:$4 sm:$0xff]   ;;  %v5207_v24 = vld [vmem:[%s7559_s2 + $0x480] ss:$16 sps:$4 sm:$0xff]  }
  0x41   : > { %1690 = vmatpush2.bf16.msra.mxu1 %v5152_v39  ;;  %1650 = vmatprep.subr.bf16.mxu0 %v5153_v40  ;;  %v5215_v26 = vld [vmem:[%s7559_s2 + $0x464] ss:$16 sps:$4 sm:$0xff]   ;;  %v5213_v28 = vld [vmem:[%s7559_s2 + $0x460] ss:$16 sps:$4 sm:$0xff]   ;;  %v5230_v39 = vld [vmem:[%s7559_s2 + $0x4c] ss:$16 sps:$4 sm:$0xff]  }
  0x42   : > { %1691 = vmatprep.subr.bf16.mxu1 %v5155_v41  ;;  %v5221_v30 = vld [vmem:[%s7559_s2 + $0x444] ss:$16 sps:$4 sm:$0xff]   ;;  %v5219_v32 = vld [vmem:[%s7559_s2 + $0x440] ss:$16 sps:$4 sm:$0xff]   ;;  %v5228_v41 = vld [vmem:[%s7559_s2 + $0x48] ss:$16 sps:$4 sm:$0xff]  }
  0x43   : > { %v5227_v34 = vld [vmem:[%s7559_s2 + $0x424] ss:$16 sps:$4 sm:$0xff]   ;;  %v5225_v38 = vld [vmem:[%s7559_s2 + $0x420] ss:$16 sps:$4 sm:$0xff]  }
  0x44   : > { %1651 = vmatpush2.bf16.msra.mxu0 %v5157_v42  ;;  %v5233_v40 = vld [vmem:[%s7559_s2 + $0x404] ss:$16 sps:$4 sm:$0xff]   ;;  %v5231_v42 = vld [vmem:[%s7559_s2 + $0x400] ss:$16 sps:$4 sm:$0xff]  }
  0x45   : > { %1692 = vmatpush2.bf16.msra.mxu1 %v5158_v43  ;;  %1652 = vmatprep.subr.bf16.mxu0 %v5159_v44  ;;  %v5236_v43 = vld [vmem:[%s7559_s2 + $0x2c] ss:$16 sps:$4 sm:$0xff]   ;;  %v5239_v44 = vld [vmem:[%s7559_s2 + $0x5e4] ss:$16 sps:$4 sm:$0xff]   ;;  %v5237_v46 = vld [vmem:[%s7559_s2 + $0x5e0] ss:$16 sps:$4 sm:$0xff]  }
  0x46   : > { %1693 = vmatprep.subr.bf16.mxu1 %v5161_v45  ;;  %v5234_v45 = vld [vmem:[%s7559_s2 + $0x28] ss:$16 sps:$4 sm:$0xff]   ;;  %v5243_v50 = vld [vmem:[%s7559_s2 + $0x5c0] ss:$16 sps:$4 sm:$0xff]   ;;  %v5275_v5 = vld [vmem:[%s7559_s2 + $0x524] ss:$16 sps:$4 sm:$0xff]  }
  0x47   : > { %v418_v15 = vld [vmem:[%s6123_s23 + $0x20] sm:$0xff]  ;;  %s4473_s23 = sshll.u32 %s6748_s16, 3 }
  0x48   : > { %1653 = vmatpush2.bf16.msra.mxu0 %v5163_v47  ;;  %v5242_v47 = vld [vmem:[%s7559_s2 + $0xc] ss:$16 sps:$4 sm:$0xff]   ;;  %s6754_s24 = scalar_lea.vmem [#allocation4], %s4473_s23 }
  0x49   : > { %1694 = vmatpush2.bf16.msra.mxu1 %v5164_v48  ;;  %1654 = vmatprep.subr.bf16.mxu0 %v5165_v51  ;;  %v5245_v48 = vld [vmem:[%s7559_s2 + $0x5c4] ss:$16 sps:$4 sm:$0xff]   ;;  %v5248_v51 = vld [vmem:[%s7559_s2 + $0x1ec] ss:$16 sps:$4 sm:$0xff]   ;;  %s4366_s25 = sshll.u32 %s6754_s24, 4  ;;  %s4367_s25 = int_to_ptr.vmem [resolvable:$true] %s4366_s25 }
  0x4a   : > { %1695 = vmatprep.subr.bf16.mxu1 %v5167_v53  ;;  %v5251_v53 = vld [vmem:[%s7559_s2 + $0x5a4] ss:$16 sps:$4 sm:$0xff]   ;;  %s5779_s12 = scalar_lea.vmem %s4367_s25, 128 }
  0x4b   : > { %p5780_p11 = scmp.ne.s32.totalorder %s4367_s25, %s5779_s12 }
  0x4c   : > { %1655 = vmatpush2.bf16.msra.mxu0 %v5169_v54  ;;  %v5246_v54 = vld [vmem:[%s7559_s2 + $0x1e8] ss:$16 sps:$4 sm:$0xff]  }
  0x4d   : > { %1696 = vmatpush2.bf16.msra.mxu1 %v5170_v55  ;;  %1656 = vmatprep.subr.bf16.mxu0 %v5171_v56  ;;  %v5249_v55 = vld [vmem:[%s7559_s2 + $0x5a0] ss:$16 sps:$4 sm:$0xff]   ;;  %v5254_v56 = vld [vmem:[%s7559_s2 + $0x1cc] ss:$16 sps:$4 sm:$0xff]   ;;  %p5781_p12 = pnand %p5780_p11, %p5973_p5 }
  0x4e   : > { %1697 = vmatprep.subr.bf16.mxu1 %v5173_v57  ;;  %v5257_v57 = vld [vmem:[%s7559_s2 + $0x584] ss:$16 sps:$4 sm:$0xff]  }
  0x4f   : > { %p5782_p13 = pneg %p5781_p12 }
  0x50   : > { %1657 = vmatpush2.bf16.msra.mxu0 %v5175_v58  ;;  %v5252_v58 = vld [vmem:[%s7559_s2 + $0x1c8] ss:$16 sps:$4 sm:$0xff]  }
  0x51   : > { %1698 = vmatpush2.bf16.msra.mxu1 %v5176_v59  ;;  %1658 = vmatprep.subr.bf16.mxu0 %v5177_v60  ;;  %v5255_v59 = vld [vmem:[%s7559_s2 + $0x580] ss:$16 sps:$4 sm:$0xff]   ;;  %v5260_v60 = vld [vmem:[%s7559_s2 + $0x1ac] ss:$16 sps:$4 sm:$0xff]  }
  0x52   : > { %1699 = vmatprep.subr.bf16.mxu1 %v5179_v61  ;;  %v5263_v61 = vld [vmem:[%s7559_s2 + $0x564] ss:$16 sps:$4 sm:$0xff]  }
  0x54   : > { %1659 = vmatpush2.bf16.msra.mxu0 %v5181_v62  ;;  %v5258_v62 = vld [vmem:[%s7559_s2 + $0x1a8] ss:$16 sps:$4 sm:$0xff]  }
  0x55   : > { %1700 = vmatpush2.bf16.msra.mxu1 %v5182_v63  ;;  %1660 = vmatprep.subr.bf16.mxu0 %v5183_v0  ;;  %v5261_v63 = vld [vmem:[%s7559_s2 + $0x560] ss:$16 sps:$4 sm:$0xff]   ;;  %v5266_v0 = vld [vmem:[%s7559_s2 + $0x18c] ss:$16 sps:$4 sm:$0xff]  }
  0x56   : > { %1701 = vmatprep.subr.bf16.mxu1 %v5185_v1  ;;  %v5269_v1 = vld [vmem:[%s7559_s2 + $0x544] ss:$16 sps:$4 sm:$0xff]  }
  0x58   : > { %1661 = vmatpush2.bf16.msra.mxu0 %v5187_v2  ;;  %v5264_v2 = vld [vmem:[%s7559_s2 + $0x188] ss:$16 sps:$4 sm:$0xff]  }
  0x59   : > { %1702 = vmatpush2.bf16.msra.mxu1 %v5188_v3  ;;  %1712 = vmatprep.subr.bf16.mxu0 %v5191_v6  ;;  %v5267_v3 = vld [vmem:[%s7559_s2 + $0x540] ss:$16 sps:$4 sm:$0xff]   ;;  %v5270_v6 = vld [vmem:[%s7559_s2 + $0x168] ss:$16 sps:$4 sm:$0xff]  }
  0x5a   : > { %1767 = vmatprep.subr.bf16.mxu1 %v5194_v7  ;;  %v5273_v7 = vld [vmem:[%s7559_s2 + $0x520] ss:$16 sps:$4 sm:$0xff]  }
  0x5b   : > { %1663 = vmatmul.mubr.bf16.vlgmr.msra.gmra.mxu0 %v6201_v8 }
  0x5c   : > { %1704 = vmatmul.mubr.bf16.vlgmr.msra.gmra.mxu1 %v6203_v9  ;;  %1713 = vmatpush1.bf16.msra.mxu0 %v5189_v10  ;;  %v5278_v10 = vld [vmem:[%s7559_s2 + $0x14c] ss:$16 sps:$4 sm:$0xff]  }
  0x5d   : > { %1768 = vmatpush1.bf16.msra.mxu1 %v5192_v11  ;;  %1714 = vmatprep.subr.bf16.mxu0 %v5197_v12  ;;  %v5281_v11 = vld [vmem:[%s7559_s2 + $0x504] ss:$16 sps:$4 sm:$0xff]   ;;  %v5276_v12 = vld [vmem:[%s7559_s2 + $0x148] ss:$16 sps:$4 sm:$0xff]  }
  0x5e   : > { %1785 = vmatprep.mubr.bf16.mxu1 %v5871_v16  ;;  %1794 = vmatprep.subr.bf16.mxu1 %v5200_v13  ;;  %v5279_v13 = vld [vmem:[%s7559_s2 + $0x500] ss:$16 sps:$4 sm:$0xff]  }
  0x5f   : > { %1744 = vmatprep.mubr.bf16.mxu0 %v6281_v36 }
  0x60   : > { %1715 = vmatpush1.bf16.msra.mxu0 %v5195_v14  ;;  %v5284_v14 = vld [vmem:[%s7559_s2 + $0x12c] ss:$16 sps:$4 sm:$0xff]  }
  0x61   : > { %1716 = vmatprep.subr.bf16.mxu0 %v5203_v17  ;;  %v5287_v17 = vld [vmem:[%s7559_s2 + $0x2ec] ss:$16 sps:$4 sm:$0xff]  }
  0x64   : > { %4672 = vmatmul.mubr.msk.bf16.vlgmr.msra.gmra.mxu1 %vm1626_vm0, %v6230_v19  ;;  %1717 = vmatpush1.bf16.msra.mxu0 %v5201_v20  ;;  %v6408_v20 = vpack.c.bf16 %v418_v15, %v418_v15  ;;  %v5374_v15 = vld [vmem:[%s7559_s2 + $0x54c] ss:$16 sps:$4 sm:$0xff]  }
  0x65   : > { %1795 = vmatpush1.bf16.msra.mxu1 %v5198_v18  ;;  %1718 = vmatprep.subr.bf16.mxu0 %v5209_v22  ;;  %v5282_v18 = vld [vmem:[%s7559_s2 + $0x128] ss:$16 sps:$4 sm:$0xff]   ;;  %v5290_v22 = vld [vmem:[%s7559_s2 + $0x10c] ss:$16 sps:$4 sm:$0xff]  }
  0x66   : > { %1796 = vmatprep.subr.bf16.mxu1 %v5206_v21  ;;  %1826 = vmatprep.mubr.bf16.mxu1 %v6138_v49  ;;  %v5240_v49 = vld [vmem:[%s7559_s2 + $0x8] ss:$16 sps:$4 sm:$0xff]  }
  0x67   : > { %v5285_v21 = vld [vmem:[%s7559_s2 + $0x2e8] ss:$16 sps:$4 sm:$0xff]  }
  0x68   : > { %1719 = vmatpush1.bf16.msra.mxu0 %v5207_v24  ;;  %v5288_v24 = vld [vmem:[%s7559_s2 + $0x108] ss:$16 sps:$4 sm:$0xff]  }
  0x69   : > { %1797 = vmatpush1.bf16.msra.mxu1 %v5204_v23  ;;  %1720 = vmatprep.subr.bf16.mxu0 %v5215_v26  ;;  %v5293_v23 = vld [vmem:[%s7559_s2 + $0x2cc] ss:$16 sps:$4 sm:$0xff]  }
  0x6a   : > { %1798 = vmatprep.subr.bf16.mxu1 %v5212_v25  ;;  %v5291_v25 = vld [vmem:[%s7559_s2 + $0x2c8] ss:$16 sps:$4 sm:$0xff]   ;;  %v5296_v26 = vld [vmem:[%s7559_s2 + $0x4ec] ss:$16 sps:$4 sm:$0xff]  }
  0x6c   : > { %1721 = vmatpush1.bf16.msra.mxu0 %v5213_v28  ;;  %v5294_v28 = vld [vmem:[%s7559_s2 + $0x4e8] ss:$16 sps:$4 sm:$0xff]  }
  0x6d   : > { %1799 = vmatpush1.bf16.msra.mxu1 %v5210_v27  ;;  %1722 = vmatprep.subr.bf16.mxu0 %v5221_v30  ;;  %v5299_v27 = vld [vmem:[%s7559_s2 + $0x2ac] ss:$16 sps:$4 sm:$0xff]  }
  0x6e   : > { %1800 = vmatprep.subr.bf16.mxu1 %v5218_v29  ;;  %v5297_v29 = vld [vmem:[%s7559_s2 + $0x2a8] ss:$16 sps:$4 sm:$0xff]   ;;  %v5302_v30 = vld [vmem:[%s7559_s2 + $0x4cc] ss:$16 sps:$4 sm:$0xff]  }
  0x70   : > { %1723 = vmatpush1.bf16.msra.mxu0 %v5219_v32  ;;  %v5300_v32 = vld [vmem:[%s7559_s2 + $0x4c8] ss:$16 sps:$4 sm:$0xff]  }
  0x71   : > { %1801 = vmatpush1.bf16.msra.mxu1 %v5216_v31  ;;  %1724 = vmatprep.subr.bf16.mxu0 %v5227_v34  ;;  %v5305_v31 = vld [vmem:[%s7559_s2 + $0x28c] ss:$16 sps:$4 sm:$0xff]  }
  0x72   : > { %1802 = vmatprep.subr.bf16.mxu1 %v5224_v33  ;;  %v5308_v33 = vld [vmem:[%s7559_s2 + $0x4ac] ss:$16 sps:$4 sm:$0xff]  }
  0x73   : > { %v5311_v34 = vld [vmem:[%s7559_s2 + $0x26c] ss:$16 sps:$4 sm:$0xff]  }
  0x74   : > { %1725 = vmatpush1.bf16.msra.mxu0 %v5225_v38  ;;  %v5317_v38 = vld [vmem:[%s7559_s2 + $0x24c] ss:$16 sps:$4 sm:$0xff]  }
  0x75   : > { %1803 = vmatpush1.bf16.msra.mxu1 %v5222_v37  ;;  %1726 = vmatprep.subr.bf16.mxu0 %v5233_v40  ;;  %v5314_v37 = vld [vmem:[%s7559_s2 + $0x48c] ss:$16 sps:$4 sm:$0xff]  }
  0x76   : > { %1804 = vmatprep.subr.bf16.mxu1 %v5230_v39  ;;  %v5312_v39 = vld [vmem:[%s7559_s2 + $0x488] ss:$16 sps:$4 sm:$0xff]   ;;  %v5320_v40 = vld [vmem:[%s7559_s2 + $0x46c] ss:$16 sps:$4 sm:$0xff]  }
  0x78   : > { %1727 = vmatpush1.bf16.msra.mxu0 %v5231_v42  ;;  %v5318_v42 = vld [vmem:[%s7559_s2 + $0x468] ss:$16 sps:$4 sm:$0xff]  }
  0x79   : > { %1805 = vmatpush1.bf16.msra.mxu1 %v5228_v41  ;;  %1728 = vmatprep.subr.bf16.mxu0 %v5239_v44  ;;  %v5323_v41 = vld [vmem:[%s7559_s2 + $0x22c] ss:$16 sps:$4 sm:$0xff]  }
  0x7a   : > { %1806 = vmatprep.subr.bf16.mxu1 %v5236_v43  ;;  %v5321_v43 = vld [vmem:[%s7559_s2 + $0x228] ss:$16 sps:$4 sm:$0xff]   ;;  %v5326_v44 = vld [vmem:[%s7559_s2 + $0x44c] ss:$16 sps:$4 sm:$0xff]  }
  0x7c   : > { %1729 = vmatpush2.bf16.msra.mxu0 %v5237_v46  ;;  %v5324_v46 = vld [vmem:[%s7559_s2 + $0x448] ss:$16 sps:$4 sm:$0xff]  }
  0x7d   : > { %1807 = vmatpush1.bf16.msra.mxu1 %v5234_v45  ;;  %1730 = vmatprep.subr.bf16.mxu0 %v5245_v48  ;;  %v5329_v45 = vld [vmem:[%s7559_s2 + $0x20c] ss:$16 sps:$4 sm:$0xff]  }
  0x7e   : > { %1808 = vmatprep.subr.bf16.mxu1 %v5242_v47  ;;  %v5327_v47 = vld [vmem:[%s7559_s2 + $0x208] ss:$16 sps:$4 sm:$0xff]   ;;  %v5332_v48 = vld [vmem:[%s7559_s2 + $0x42c] ss:$16 sps:$4 sm:$0xff]  }
  0x80   : > { %1731 = vmatpush2.bf16.msra.mxu0 %v5243_v50  ;;  %v5330_v50 = vld [vmem:[%s7559_s2 + $0x428] ss:$16 sps:$4 sm:$0xff]  }
  0x81   : > { %1809 = vmatpush1.bf16.msra.mxu1 %v5240_v49  ;;  %1732 = vmatprep.subr.bf16.mxu0 %v5251_v53  ;;  %v5335_v49 = vld [vmem:[%s7559_s2 + $0x3ec] ss:$16 sps:$4 sm:$0xff]  }
  0x82   : > { %1810 = vmatprep.subr.bf16.mxu1 %v5248_v51  ;;  %v5333_v51 = vld [vmem:[%s7559_s2 + $0x3e8] ss:$16 sps:$4 sm:$0xff]   ;;  %v5338_v53 = vld [vmem:[%s7559_s2 + $0x40c] ss:$16 sps:$4 sm:$0xff]  }
  0x84   : > { %1733 = vmatpush2.bf16.msra.mxu0 %v5249_v55  ;;  %v5336_v55 = vld [vmem:[%s7559_s2 + $0x408] ss:$16 sps:$4 sm:$0xff]  }
  0x85   : > { %1811 = vmatpush2.bf16.msra.mxu1 %v5246_v54  ;;  %1734 = vmatprep.subr.bf16.mxu0 %v5257_v57  ;;  %v5341_v54 = vld [vmem:[%s7559_s2 + $0x3cc] ss:$16 sps:$4 sm:$0xff]  }
  0x86   : > { %1812 = vmatprep.subr.bf16.mxu1 %v5254_v56  ;;  %v5339_v56 = vld [vmem:[%s7559_s2 + $0x3c8] ss:$16 sps:$4 sm:$0xff]   ;;  %v5344_v57 = vld [vmem:[%s7559_s2 + $0x5ec] ss:$16 sps:$4 sm:$0xff]  }
  0x88   : > { %1735 = vmatpush2.bf16.msra.mxu0 %v5255_v59  ;;  %v5342_v59 = vld [vmem:[%s7559_s2 + $0x5e8] ss:$16 sps:$4 sm:$0xff]  }
  0x89   : > { %1813 = vmatpush2.bf16.msra.mxu1 %v5252_v58  ;;  %1736 = vmatprep.subr.bf16.mxu0 %v5263_v61  ;;  %v5347_v58 = vld [vmem:[%s7559_s2 + $0x3ac] ss:$16 sps:$4 sm:$0xff]  }
  0x8a   : > { %1814 = vmatprep.subr.bf16.mxu1 %v5260_v60  ;;  %v5345_v60 = vld [vmem:[%s7559_s2 + $0x3a8] ss:$16 sps:$4 sm:$0xff]   ;;  %v5350_v61 = vld [vmem:[%s7559_s2 + $0x5cc] ss:$16 sps:$4 sm:$0xff]  }
  0x8c   : > { %1737 = vmatpush2.bf16.msra.mxu0 %v5261_v63  ;;  %v5348_v63 = vld [vmem:[%s7559_s2 + $0x5c8] ss:$16 sps:$4 sm:$0xff]  }
  0x8d   : > { %1815 = vmatpush2.bf16.msra.mxu1 %v5258_v62  ;;  %1738 = vmatprep.subr.bf16.mxu0 %v5269_v1  ;;  %v5353_v62 = vld [vmem:[%s7559_s2 + $0x38c] ss:$16 sps:$4 sm:$0xff]  }
  0x8e   : > { %1816 = vmatprep.subr.bf16.mxu1 %v5266_v0  ;;  %v5351_v0 = vld [vmem:[%s7559_s2 + $0x388] ss:$16 sps:$4 sm:$0xff]   ;;  %v5356_v1 = vld [vmem:[%s7559_s2 + $0x5ac] ss:$16 sps:$4 sm:$0xff]  }
  0x90   : > { %1739 = vmatpush2.bf16.msra.mxu0 %v5267_v3  ;;  %v5354_v3 = vld [vmem:[%s7559_s2 + $0x5a8] ss:$16 sps:$4 sm:$0xff]  }
  0x91   : > { %1817 = vmatpush2.bf16.msra.mxu1 %v5264_v2  ;;  %1740 = vmatprep.subr.bf16.mxu0 %v5275_v5  ;;  %v5359_v2 = vld [vmem:[%s7559_s2 + $0x36c] ss:$16 sps:$4 sm:$0xff]  }
  0x92   : > { %1818 = vmatprep.subr.bf16.mxu1 %v5272_v4  ;;  %v5357_v4 = vld [vmem:[%s7559_s2 + $0x368] ss:$16 sps:$4 sm:$0xff]   ;;  %v5362_v5 = vld [vmem:[%s7559_s2 + $0x58c] ss:$16 sps:$4 sm:$0xff]  }
  0x94   : > { %1741 = vmatpush2.bf16.msra.mxu0 %v5273_v7  ;;  %v5360_v7 = vld [vmem:[%s7559_s2 + $0x588] ss:$16 sps:$4 sm:$0xff]  }
  0x95   : > { %1819 = vmatpush2.bf16.msra.mxu1 %v5270_v6  ;;  %1742 = vmatprep.subr.bf16.mxu0 %v5281_v11  ;;  %v5365_v6 = vld [vmem:[%s7559_s2 + $0x34c] ss:$16 sps:$4 sm:$0xff]  }
  0x96   : > { %1820 = vmatprep.subr.bf16.mxu1 %v5278_v10  ;;  %v5363_v10 = vld [vmem:[%s7559_s2 + $0x348] ss:$16 sps:$4 sm:$0xff]   ;;  %v5368_v11 = vld [vmem:[%s7559_s2 + $0x56c] ss:$16 sps:$4 sm:$0xff]  }
  0x98   : > { %1743 = vmatpush2.bf16.msra.mxu0 %v5279_v13  ;;  %v5366_v13 = vld [vmem:[%s7559_s2 + $0x568] ss:$16 sps:$4 sm:$0xff]  }
  0x99   : > { %1821 = vmatpush2.bf16.msra.mxu1 %v5276_v12  ;;  %1835 = vmatprep.subr.bf16.mxu0 %v5287_v17  ;;  %v5371_v12 = vld [vmem:[%s7559_s2 + $0x32c] ss:$16 sps:$4 sm:$0xff]  }
  0x9a   : > { %1822 = vmatprep.subr.bf16.mxu1 %v5284_v14  ;;  %v5369_v14 = vld [vmem:[%s7559_s2 + $0x328] ss:$16 sps:$4 sm:$0xff]   ;;  %v5377_v17 = vld [vmem:[%s7559_s2 + $0x30c] ss:$16 sps:$4 sm:$0xff]  }
  0x9b   : > { %1745 = vmatmul.mubr.bf16.vlgmr.msra.gmra.mxu0 %v6408_v20 }
  0x9c   : > { %1836 = vmatpush1.bf16.msra.mxu0 %v5285_v21  ;;  %1867 = vmatprep.mubr.bf16.mxu0 %v6144_v52  ;;  %v5303_v52 = vld [vmem:[%s7559_s2 + $0x288] ss:$16 sps:$4 sm:$0xff]  }
  0x9d   : > { %1823 = vmatpush2.bf16.msra.mxu1 %v5282_v18  ;;  %1837 = vmatprep.subr.bf16.mxu0 %v5293_v23  ;;  %v5372_v18 = vld [vmem:[%s7559_s2 + $0x548] ss:$16 sps:$4 sm:$0xff]   ;;  %v5383_v23 = vld [vmem:[%s7559_s2 + $0x60c] ss:$16 sps:$4 sm:$0xff]  }
  0x9e   : > { %1824 = vmatprep.subr.bf16.mxu1 %v5290_v22  ;;  %v5375_v21 = vld [vmem:[%s7559_s2 + $0x308] ss:$16 sps:$4 sm:$0xff]   ;;  %v5380_v22 = vld [vmem:[%s7559_s2 + $0x52c] ss:$16 sps:$4 sm:$0xff]  }
  0xa0   : > { %1838 = vmatpush1.bf16.msra.mxu0 %v5291_v25  ;;  %v5381_v25 = vld [vmem:[%s7559_s2 + $0x608] ss:$16 sps:$4 sm:$0xff]  }
  0xa1   : > { %1825 = vmatpush2.bf16.msra.mxu1 %v5288_v24  ;;  %1839 = vmatprep.subr.bf16.mxu0 %v5299_v27  ;;  %v5378_v24 = vld [vmem:[%s7559_s2 + $0x528] ss:$16 sps:$4 sm:$0xff]  }
  0xa2   : > { %1876 = vmatprep.subr.bf16.mxu1 %v5296_v26  ;;  %v5386_v26 = vld [vmem:[%s7559_s2 + $0x50c] ss:$16 sps:$4 sm:$0xff]  }
  0xa3   : > { %v5387_v27 = vld [vmem:[%s7561_s4 + $0x78] sm:$0xff]  }
  0xa4   : > { %1827 = vmatmul.mubr.bf16.vlgmr.msra.gmra.mxu1 %v6201_v8  ;;  %1840 = vmatpush1.bf16.msra.mxu0 %v5297_v29  ;;  %v5309_v8 = vld [vmem:[%s7559_s2 + $0x268] ss:$16 sps:$4 sm:$0xff]  }
  0xa5   : > { %1877 = vmatpush1.bf16.msra.mxu1 %v5294_v28  ;;  %1841 = vmatprep.subr.bf16.mxu0 %v5305_v31  ;;  %v5384_v28 = vld [vmem:[%s7559_s2 + $0x508] ss:$16 sps:$4 sm:$0xff]  }
  0xa6   : > { %1878 = vmatprep.subr.bf16.mxu1 %v5302_v30  ;;  %1908 = vmatprep.mubr.bf16.mxu1 %v6281_v36  ;;  %v5315_v36 = vld [vmem:[%s7559_s2 + $0x248] ss:$16 sps:$4 sm:$0xff]   ;;  %v5389_v30 = vld [vmem:[%s7561_s4 + $0x70] sm:$0xff]  }
  0xa7   : > { %v5388_v29 = vld [vmem:[%s7561_s4 + $0x38] sm:$0xff]   ;;  %v5391_v31 = vld [vmem:[%s7561_s4 + $0x68] sm:$0xff]  }
  0xa8   : > { %1842 = vmatpush1.bf16.msra.mxu0 %v5303_v52  ;;  %v5393_v52 = vld [vmem:[%s7561_s4 + $0x60] sm:$0xff]  }
  0xa9   : > { %1879 = vmatpush1.bf16.msra.mxu1 %v5300_v32  ;;  %1843 = vmatprep.subr.bf16.mxu0 %v5311_v34  ;;  %v5392_v32 = vld [vmem:[%s7561_s4 + $0x28] sm:$0xff]   ;;  %v5394_v34 = vld [vmem:[%s7561_s4 + $0x20] sm:$0xff]  }
  0xaa   : > { %1880 = vmatprep.subr.bf16.mxu1 %v5308_v33  ;;  %v5405_v33 = vld [vmem:[%s7561_s4 + $0xf0] sm:$0xff]  }
  0xac   : > { %1844 = vmatpush1.bf16.msra.mxu0 %v5309_v8  ;;  %v5395_v8 = vld [vmem:[%s7561_s4 + $0x58] sm:$0xff]  }
  0xad   : > { %1881 = vmatpush1.bf16.msra.mxu1 %v5306_v35  ;;  %1845 = vmatprep.subr.bf16.mxu0 %v5317_v38  ;;  %v5406_v35 = vld [vmem:[%s7561_s4 + $0xb0] sm:$0xff]   ;;  %v5396_v38 = vld [vmem:[%s7561_s4 + $0x18] sm:$0xff]  }
  0xae   : > { %1882 = vmatprep.subr.bf16.mxu1 %v5314_v37  ;;  %v5407_v37 = vld [vmem:[%s7561_s4 + $0xe8] sm:$0xff]  }
  0xb0   : > { %1846 = vmatpush1.bf16.msra.mxu0 %v5315_v36  ;;  %v5397_v36 = vld [vmem:[%s7561_s4 + $0x50] sm:$0xff]  }
  0xb1   : > { %1883 = vmatpush1.bf16.msra.mxu1 %v5312_v39  ;;  %1847 = vmatprep.subr.bf16.mxu0 %v5323_v41  ;;  %v5408_v39 = vld [vmem:[%s7561_s4 + $0xa8] sm:$0xff]   ;;  %v5398_v41 = vld [vmem:[%s7561_s4 + $0x10] sm:$0xff]  }
  0xb2   : > { %1884 = vmatprep.subr.bf16.mxu1 %v5320_v40  ;;  %v5409_v40 = vld [vmem:[%s7561_s4 + $0xe0] sm:$0xff]  }
  0xb4   : > { %1848 = vmatpush1.bf16.msra.mxu0 %v5321_v43  ;;  %v5400_v43 = vld [vmem:[%s7561_s4 + $0x8] sm:$0xff]  }
  0xb5   : > { %1885 = vmatpush1.bf16.msra.mxu1 %v5318_v42  ;;  %1849 = vmatprep.subr.bf16.mxu0 %v5329_v45  ;;  %v5399_v42 = vld [vmem:[%s7561_s4 + $0x48] sm:$0xff]   ;;  %v5402_v45 = vld [vmem:[%s7561_s4] sm:$0xff]  }
  0xb6   : > { %1886 = vmatprep.subr.bf16.mxu1 %v5326_v44  ;;  %v5401_v44 = vld [vmem:[%s7561_s4 + $0x40] sm:$0xff]  }
  0xb8   : > { %1850 = vmatpush1.bf16.msra.mxu0 %v5327_v47 }
  0xb9   : > { %1887 = vmatpush1.bf16.msra.mxu1 %v5324_v46  ;;  %1851 = vmatprep.subr.bf16.mxu0 %v5335_v49  ;;  %v5410_v46 = vld [vmem:[%s7561_s4 + $0xa0] sm:$0xff]  }
  0xba   : > { %1888 = vmatprep.subr.bf16.mxu1 %v5332_v48 }
  0xbc   : > { %1852 = vmatpush2.bf16.msra.mxu0 %v5333_v51  ;;  %v5411_v51 = vld [vmem:[%s7561_s4 + $0xd8] sm:$0xff]  }
  0xbd   : > { %1889 = vmatpush1.bf16.msra.mxu1 %v5330_v50  ;;  %1853 = vmatprep.subr.bf16.mxu0 %v5341_v54 }
  0xbe   : > { %1890 = vmatprep.subr.bf16.mxu1 %v5338_v53  ;;  %v5412_v53 = vld [vmem:[%s7561_s4 + $0x98] sm:$0xff]  }
  0xc0   : > { %1854 = vmatpush2.bf16.msra.mxu0 %v5339_v56 }
  0xc1   : > { %1891 = vmatpush1.bf16.msra.mxu1 %v5336_v55  ;;  %1855 = vmatprep.subr.bf16.mxu0 %v5347_v58  ;;  %v5413_v58 = vld [vmem:[%s7561_s4 + $0xd0] sm:$0xff]  }
  0xc2   : > { %1892 = vmatprep.subr.bf16.mxu1 %v5344_v57 }
  0xc4   : > { %1856 = vmatpush2.bf16.msra.mxu0 %v5345_v60 }
  0xc5   : > { %1893 = vmatpush2.bf16.msra.mxu1 %v5342_v59  ;;  %1857 = vmatprep.subr.bf16.mxu0 %v5353_v62  ;;  %v5414_v59 = vld [vmem:[%s7561_s4 + $0x90] sm:$0xff]   ;;  %v5415_v62 = vld [vmem:[%s7561_s4 + $0xc8] sm:$0xff]  }
  0xc6   : > { %1894 = vmatprep.subr.bf16.mxu1 %v5350_v61 }
  0xc8   : > { %1858 = vmatpush2.bf16.msra.mxu0 %v5351_v0 }
  0xc9   : > { %1895 = vmatpush2.bf16.msra.mxu1 %v5348_v63  ;;  %1859 = vmatprep.subr.bf16.mxu0 %v5359_v2  ;;  %v5416_v63 = vld [vmem:[%s7561_s4 + $0x88] sm:$0xff]   ;;  %v5417_v2 = vld [vmem:[%s7561_s4 + $0xc0] sm:$0xff]  }
  0xca   : > { %1896 = vmatprep.subr.bf16.mxu1 %v5356_v1 }
  0xcc   : > { %1860 = vmatpush2.bf16.msra.mxu0 %v5357_v4  ;;  %v626_v4 = vlaneseq }
  0xcd   : > { %1897 = vmatpush2.bf16.msra.mxu1 %v5354_v3  ;;  %1861 = vmatprep.subr.bf16.mxu0 %v5365_v6  ;;  %v5418_v3 = vld [vmem:[%s7561_s4 + $0x80] sm:$0xff]  }
  0xce   : > { %1898 = vmatprep.subr.bf16.mxu1 %v5362_v5  ;;  %v6716_v5 = vshrl.u32 %v626_v4, 7  ;;  %v4674_v4 = vld [vmem:[%s7562_s5] ss:$0 sm:$0xff] }
  0xd0   : > { %1862 = vmatpush2.bf16.msra.mxu0 %v5363_v10  ;;  %v6719_v6 = vsub.s32 0, %v6716_v5  ;;  %v6725_v10 = vsub.s32 1, %v6716_v5 }
  0xd1   : > { %1899 = vmatpush2.bf16.msra.mxu1 %v5360_v7  ;;  %1863 = vmatprep.subr.bf16.mxu0 %v5371_v12  ;;  %v624_v7 = vld [vmem:[%s7560_s3] sm:$0xf] }
  0xd2   : > { %1900 = vmatprep.subr.bf16.mxu1 %v5368_v11  ;;  %v629_v11 = vrot.slane %v624_v7, %v6719_v6  ;;  %v633_v12 = vrot.slane %v624_v7, %v6725_v10 }
  0xd4   : > { %1864 = vmatpush2.bf16.msra.mxu0 %v5369_v14 }
  0xd5   : > { %1901 = vmatpush2.bf16.msra.mxu1 %v5366_v13  ;;  %1865 = vmatprep.subr.bf16.mxu0 %v5377_v17 }
  0xd6   : > { %1902 = vmatprep.subr.bf16.mxu1 %v5374_v15 }
  0xd8   : > { %1866 = vmatpush2.bf16.msra.mxu0 %v5375_v21 }
  0xd9   : > { %1903 = vmatpush2.bf16.msra.mxu1 %v5372_v18  ;;  %1931 = vmatprep.subr.bf16.mxu0 %v5383_v23 }
  0xda   : > { %1904 = vmatprep.subr.bf16.mxu1 %v5380_v22 }
  0xdb   : > { %1868 = vmatmul.mubr.bf16.vlgmr.msra.gmra.mxu0 %v6203_v9  ;;  %v5390_v9 = vld [vmem:[%s7561_s4 + $0x30] sm:$0xff]  }
  0xdc   : > { %1932 = vmatpush1.bf16.msra.mxu0 %v5381_v25  ;;  %1949 = vmatprep.mubr.bf16.mxu0 %v5871_v16 }
  0xdd   : > { %1905 = vmatpush2.bf16.msra.mxu1 %v5378_v24  ;;  %4956 = vmatprep.subr.bf16.mxu0 %v5387_v27 }
  0xde   : > { %1906 = vmatprep.subr.bf16.mxu1 %v5386_v26 }
  0xe1   : > { %1907 = vmatpush2.bf16.msra.mxu1 %v5384_v28 }
  0xe3   : > { %4673 = vmatmul.mubr.msk.bf16.vlgmr.msra.gmra.mxu0 %vm1626_vm0, %v6230_v19  ;;  %v5403_v19 = vld [vmem:[%s7561_s4 + $0xf8] sm:$0xff]  }
  0xe4   : > { %1909 = vmatmul.mubr.bf16.vlgmr.msra.gmra.mxu1 %v6408_v20  ;;  %4957 = vmatpush3.bf16.msra.mxu0 %v5388_v29  ;;  %v5404_v20 = vld [vmem:[%s7561_s4 + $0xb8] sm:$0xff]  }
  0xe5   : > { %4958 = vmatprep.subr.bf16.mxu0 %v5389_v30  ;;  %4978 = vmatprep.subr.bf16.mxu1 %v5403_v19 }
  0xe6   : > { %4979 = vmatpush3.bf16.msra.mxu1 %v5404_v20  ;;  %v6731_v20 = vsub.s32 2, %v6716_v5 }
  0xe7   : > { %4980 = vmatprep.subr.bf16.mxu1 %v5405_v33  ;;  %v6734_v33 = vsub.s32 3, %v6716_v5 }
  0xe8   : > { %4959 = vmatpush3.bf16.msra.mxu0 %v5390_v9 }
  0xe9   : > { %4960 = vmatprep.subr.bf16.mxu0 %v5391_v31 }
  0xea   : > { %4981 = vmatpush3.bf16.msra.mxu1 %v5406_v35  ;;  %v637_v35 = vrot.slane %v624_v7, %v6731_v20 }
  0xeb   : > { %4982 = vmatprep.subr.bf16.mxu1 %v5407_v37  ;;  %v641_v37 = vrot.slane %v624_v7, %v6734_v33 }
  0xec   : > { %4961 = vmatpush3.bf16.msra.mxu0 %v5392_v32 }
  0xed   : > { %4962 = vmatprep.subr.bf16.mxu0 %v5393_v52 }
  0xee   : > { %4983 = vmatpush3.bf16.msra.mxu1 %v5408_v39 }
  0xef   : > { %4984 = vmatprep.subr.bf16.mxu1 %v5409_v40 }
  0xf0   : > { %4963 = vmatpush3.bf16.msra.mxu0 %v5394_v34 }
  0xf1   : > { %4964 = vmatprep.subr.bf16.mxu0 %v5395_v8 }
  0xf2   : > { %4985 = vmatpush3.bf16.msra.mxu1 %v5410_v46 }
  0xf3   : > { %4986 = vmatprep.subr.bf16.mxu1 %v5411_v51 }
  0xf4   : > { %4965 = vmatpush3.bf16.msra.mxu0 %v5396_v38 }
  0xf5   : > { %4966 = vmatprep.subr.bf16.mxu0 %v5397_v36 }
  0xf6   : > { %4987 = vmatpush3.bf16.msra.mxu1 %v5412_v53 }
  0xf7   : > { %4988 = vmatprep.subr.bf16.mxu1 %v5413_v58 }
  0xf8   : > { %4967 = vmatpush3.bf16.msra.mxu0 %v5398_v41 }
  0xf9   : > { %4968 = vmatprep.subr.bf16.mxu0 %v5399_v42 }
  0xfa   : > { %4989 = vmatpush3.bf16.msra.mxu1 %v5414_v59 }
  0xfb   : > { %4990 = vmatprep.subr.bf16.mxu1 %v5415_v62 }
  0xfc   : > { %4969 = vmatpush3.bf16.msra.mxu0 %v5400_v43 }
  0xfd   : > { %4970 = vmatprep.subr.bf16.mxu0 %v5401_v44 }
  0xfe   : > { %4991 = vmatpush3.bf16.msra.mxu1 %v5416_v63 }
  0xff   : > { %4992 = vmatprep.subr.bf16.mxu1 %v5417_v2 }
 0x100   : > { %4971 = vmatpush3.bf16.msra.mxu0 %v5402_v45 }
 0x102   : > { %4993 = vmatpush3.bf16.msra.mxu1 %v5418_v3 }
 0x11b   : > { %v1664_v47 = vpop.f32.mrf.mxu0 }
 0x11c   : > { %v1705_v48 = vpop.f32.mrf.mxu1  ;;  %v1665_v13 = vadd.f32 %v1664_v47, %v629_v11 }
 0x11d   : > { %v1666_v49 = vpop.f32.mrf.mxu0 }
 0x11e   : > { %v1707_v50 = vpop.f32.mrf.mxu1  ;;  %v1667_v14 = vadd.f32 %v1666_v49, %v633_v12  ;;  %v1706_v15 = vadd.f32 %v1705_v48, %v1665_v13 }
 0x11f   : > { %v1668_v54 = vpop.f32.mrf.mxu0 }
 0x120   : > { %v1709_v55 = vpop.f32.mrf.mxu1  ;;  %v1708_v18 = vadd.f32 %v1707_v50, %v1667_v14 }
 0x121   : > { %v1669_v56 = vpop.f32.mrf.mxu0 }
 0x122   : > { %v1710_v57 = vpop.f32.mrf.mxu1 }
 0x124   : > { %v1787_v60 = vpop.f32.mrf.mxu1 }
 0x126   : > { %v1789_v61 = vpop.f32.mrf.mxu1 }
 0x128   : > { %v1791_v0 = vpop.f32.mrf.mxu1 }
 0x12a   : > { %v1792_v1 = vpop.f32.mrf.mxu1 }
 0x15b   : > { %v1746_v17 = vpop.f32.mrf.mxu0 }
 0x15c   : > { %v1747_v21 = vadd.f32 %v1746_v17, %v1706_v15 }
 0x15d   : > { %v1748_v22 = vpop.f32.mrf.mxu0 }
 0x15e   : > { %v1788_v23 = vadd.f32 %v1787_v60, %v1747_v21  ;;  %v1749_v24 = vadd.f32 %v1748_v22, %v1708_v18  ;;  %v2324_v60 = vld [vmem:[%s7563_s6 + $0x20] sm:$0x33] }
 0x15f   : > { %v1750_v25 = vpop.f32.mrf.mxu0  ;;  %v4712_v62 = vcombine.high %v2324_v60, %v2324_v60  ;;  %v4711_v21 = vcombine.low %v2324_v60, %v2324_v60  ;;  %v5465_v60 = vld [vmem:[%s7565_s8 + $0x38] ss:$28 sps:$4 sm:$0xff]  }
 0x160   : > { %v1790_v26 = vadd.f32 %v1789_v61, %v1749_v24  ;;  %v1958_v27 = vmax.f32 %v1788_v23, 0.0  ;;  %v2325_v61 = vld [vmem:[%s7563_s6 + $0x28] sm:$0x33] }
 0x161   : > { %v1751_v28 = vpop.f32.mrf.mxu0  ;;  %v4714_v63 = vcombine.high %v2325_v61, %v2325_v61  ;;  %4715 = vmatprep.subr.msk.bf16.mxu0 %vm2382_vm1, %v4712_v62  ;;  %v4713_v22 = vcombine.low %v2325_v61, %v2325_v61  ;;  %v2384_v24 = vsel %vm2382_vm1, %v4711_v21, 0  ;;  %v5468_v61 = vld [vmem:[%s7565_s8 + $0x3b8] ss:$28 sps:$4 sm:$0xff]   ;;  %v5473_v62 = vld [vmem:[%s7565_s8 + $0x4] ss:$28 sps:$4 sm:$0xff]  }
 0x162   : > { %v1959_v29 = vmax.f32 %v1790_v26, 0.0  ;;  %v1962_v31 = vpack.c.bf16 %v1958_v27, %v1958_v27  ;;  %v5425_v26 = vld [vmem:[%s7563_s6 + $0x4] ss:$16 sps:$4 sm:$0xff]   ;;  %v5428_v27 = vld [vmem:[%s7563_s6 + $0xc] ss:$16 sps:$4 sm:$0xff]  }
 0x163   : > { %4717 = vmatprep.subr.msk.bf16.mxu1 %vm2382_vm1, %v4714_v63  ;;  %v2390_v25 = vsel %vm2382_vm1, %v4713_v22, 0  ;;  %v5423_v28 = vld [vmem:[%s7563_s6] ss:$16 sps:$4 sm:$0xff]  }
 0x164   : > { %v1828_v30 = vpop.f32.mrf.mxu1  ;;  %v1963_v9 = vpack.c.bf16 %v1959_v29, %v1959_v29  ;;  %v5426_v29 = vld [vmem:[%s7563_s6 + $0x8] ss:$16 sps:$4 sm:$0xff]   ;;  %v5476_v63 = vld [vmem:[%s7565_s8 + $0x384] ss:$28 sps:$4 sm:$0xff]  }
 0x165   : > { %v1829_v39 = vadd.f32 %v1828_v30, %v637_v35  ;;  %v5431_v30 = vld [vmem:[%s7565_s8 + $0x18c] ss:$28 sps:$4 sm:$0xff]   ;;  %v5497_v21 = vld [vmem:[%s7565_s8 + $0x2a4] ss:$28 sps:$4 sm:$0xff]  }
 0x166   : > { %v1830_v32 = vpop.f32.mrf.mxu1  ;;  %2261 = vmatprep.mubr.bf16.mxu0 %v1963_v9  ;;  %v5434_v9 = vld [vmem:[%s7565_s8 + $0x50c] ss:$28 sps:$4 sm:$0xff]   ;;  %v5500_v22 = vld [vmem:[%s7565_s8 + $0x624] ss:$28 sps:$4 sm:$0xff]  }
 0x167   : > { %2262 = vmatmul.mubr.bf16.vlgmr.msra.gmra.mxu0 %v1962_v31  ;;  %v1831_v40 = vadd.f32 %v1830_v32, %v641_v37  ;;  %v2309_v32 = vld [vmem:[%s412_s19] sm:$0xff]  ;;  %s4949_s19 = sshll.u32 %s5956_s21, 7 }
 0x168   : > { %v1832_v52 = vpop.f32.mrf.mxu1  ;;  %2427 = vmatprep.mubr.bf16.mxu0 %v5871_v16  ;;  %2408 = vmatpush1.bf16.msra.mxu0 %v2384_v24  ;;  %v5429_v35 = vld [vmem:[%s7565_s8 + $0x188] ss:$28 sps:$4 sm:$0xff]   ;;  %v5498_v24 = vld [vmem:[%s7565_s8 + $0x620] ss:$28 sps:$4 sm:$0xff]   ;;  %s4364_s29 = scalar_lea.hbm %s7568_s11, %s4949_s19 }
 0x169   : > { %2409 = vmatprep.subr.bf16.mxu0 %v5425_v26  ;;  %v5506_v26 = vld [vmem:[%s7565_s8 + $0x5ec] ss:$28 sps:$4 sm:$0xff]  }
 0x16a   : > { %v1833_v19 = vpop.f32.mrf.mxu1 }
 0x16c   : > { %2410 = vmatpush1.bf16.msra.mxu0 %v5423_v28  ;;  %v5504_v28 = vld [vmem:[%s7565_s8 + $0x5e8] ss:$28 sps:$4 sm:$0xff]  }
 0x16d   : > { %3930 = vmatprep.subr.bf16.mxu0 %v5431_v30  ;;  %v5512_v30 = vld [vmem:[%s7565_s8 + $0x5b4] ss:$28 sps:$4 sm:$0xff]  }
 0x19b   : > { %v1869_v34 = vpop.f32.mrf.mxu0 }
 0x19c   : > { %v1870_v41 = vadd.f32 %v1869_v34, %v1829_v39  ;;  %v5440_v39 = vld [vmem:[%s7565_s8 + $0x4d4] ss:$28 sps:$4 sm:$0xff]  }
 0x19d   : > { %v1871_v8 = vpop.f32.mrf.mxu0 }
 0x19e   : > { %v1872_v44 = vadd.f32 %v1871_v8, %v1831_v40  ;;  %v5432_v8 = vld [vmem:[%s7565_s8 + $0x508] ss:$28 sps:$4 sm:$0xff]   ;;  %v5438_v40 = vld [vmem:[%s7565_s8 + $0x4d0] ss:$28 sps:$4 sm:$0xff]  }
 0x19f   : > { %v1873_v38 = vpop.f32.mrf.mxu0 }
 0x1a0   : > { %v5437_v38 = vld [vmem:[%s7565_s8 + $0x154] ss:$28 sps:$4 sm:$0xff]  }
 0x1a1   : > { %v1874_v36 = vpop.f32.mrf.mxu0 }
 0x1a2   : > { %v5435_v36 = vld [vmem:[%s7565_s8 + $0x150] ss:$28 sps:$4 sm:$0xff]  }
 0x1a3   : > { %v1951_v43 = vpop.f32.mrf.mxu0 }
 0x1a4   : > { %v1910_v42 = vpop.f32.mrf.mxu1 }
 0x1a5   : > { %v1911_v45 = vadd.f32 %v1910_v42, %v1870_v41  ;;  %v1953_v47 = vpop.f32.mrf.mxu0  ;;  %v5443_v41 = vld [vmem:[%s7565_s8 + $0x11c] ss:$28 sps:$4 sm:$0xff]  }
 0x1a6   : > { %v1912_v46 = vpop.f32.mrf.mxu1  ;;  %v5446_v42 = vld [vmem:[%s7565_s8 + $0x49c] ss:$28 sps:$4 sm:$0xff]  }
 0x1a7   : > { %v1952_v48 = vadd.f32 %v1951_v43, %v1911_v45  ;;  %v1913_v49 = vadd.f32 %v1912_v46, %v1872_v44  ;;  %v1955_v51 = vpop.f32.mrf.mxu0  ;;  %v5441_v43 = vld [vmem:[%s7565_s8 + $0x118] ss:$28 sps:$4 sm:$0xff]   ;;  %v5449_v45 = vld [vmem:[%s7565_s8 + $0xe4] ss:$28 sps:$4 sm:$0xff]  }
 0x1a8   : > { %v1914_v50 = vpop.f32.mrf.mxu1  ;;  %v5444_v44 = vld [vmem:[%s7565_s8 + $0x498] ss:$28 sps:$4 sm:$0xff]   ;;  %v5452_v46 = vld [vmem:[%s7565_s8 + $0x464] ss:$28 sps:$4 sm:$0xff]  }
 0x1a9   : > { %v1954_v53 = vadd.f32 %v1953_v47, %v1913_v49  ;;  %v1960_v54 = vmax.f32 %v1952_v48, 0.0  ;;  %v1956_v56 = vpop.f32.mrf.mxu0  ;;  %v5447_v47 = vld [vmem:[%s7565_s8 + $0xe0] ss:$28 sps:$4 sm:$0xff]   ;;  %v5455_v49 = vld [vmem:[%s7565_s8 + $0xac] ss:$28 sps:$4 sm:$0xff]  }
 0x1aa   : > { %v1915_v55 = vpop.f32.mrf.mxu1  ;;  %v5450_v48 = vld [vmem:[%s7565_s8 + $0x460] ss:$28 sps:$4 sm:$0xff]   ;;  %v5458_v50 = vld [vmem:[%s7565_s8 + $0x42c] ss:$28 sps:$4 sm:$0xff]  }
 0x1ab   : > { %v1961_v57 = vmax.f32 %v1954_v53, 0.0  ;;  %v1964_v59 = vpack.c.bf16 %v1960_v54, %v1960_v54  ;;  %v5453_v51 = vld [vmem:[%s7565_s8 + $0xa8] ss:$28 sps:$4 sm:$0xff]   ;;  %v5461_v54 = vld [vmem:[%s7565_s8 + $0x74] ss:$28 sps:$4 sm:$0xff]  }
 0x1ac   : > { %v5456_v53 = vld [vmem:[%s7565_s8 + $0x428] ss:$28 sps:$4 sm:$0xff]   ;;  %v5464_v55 = vld [vmem:[%s7565_s8 + $0x3f4] ss:$28 sps:$4 sm:$0xff]  }
 0x1ad   : > { %v1965_v58 = vpack.c.bf16 %v1961_v57, %v1961_v57  ;;  %v5459_v56 = vld [vmem:[%s7565_s8 + $0x70] ss:$28 sps:$4 sm:$0xff]  }
 0x1ae   : > { %v5462_v57 = vld [vmem:[%s7565_s8 + $0x3f0] ss:$28 sps:$4 sm:$0xff]  }
 0x1af   : > { %2301 = vmatprep.mubr.bf16.mxu1 %v1965_v58  ;;  %v5467_v58 = vld [vmem:[%s7565_s8 + $0x3c] ss:$28 sps:$4 sm:$0xff]  }
 0x1b0   : > { %2302 = vmatmul.mubr.bf16.vlgmr.msra.gmra.mxu1 %v1964_v59  ;;  %v5470_v59 = vld [vmem:[%s7565_s8 + $0x3bc] ss:$28 sps:$4 sm:$0xff]  }
 0x1b1   : > { %2468 = vmatprep.mubr.bf16.mxu1 %v5871_v16  ;;  %2449 = vmatpush1.bf16.msra.mxu1 %v2390_v25  ;;  %v5503_v25 = vld [vmem:[%s7565_s8 + $0x26c] ss:$28 sps:$4 sm:$0xff]  }
 0x1b2   : > { %2450 = vmatprep.subr.bf16.mxu1 %v5428_v27  ;;  %v5501_v27 = vld [vmem:[%s7565_s8 + $0x268] ss:$28 sps:$4 sm:$0xff]  }
 0x1b5   : > { %2451 = vmatpush1.bf16.msra.mxu1 %v5426_v29  ;;  %v5509_v29 = vld [vmem:[%s7565_s8 + $0x234] ss:$28 sps:$4 sm:$0xff]  }
 0x1b6   : > { %3971 = vmatprep.subr.bf16.mxu1 %v5434_v9  ;;  %v5507_v9 = vld [vmem:[%s7565_s8 + $0x230] ss:$28 sps:$4 sm:$0xff]  }
 0x227   : > { %v4972_v0 = vpop.f32.mrf.mxu0 }
 0x229   : > { %v4973_v1 = vpop.f32.mrf.mxu0 }
 0x22a   : > { %v4974_v2 = vadd.f32 %v4973_v1, %v4972_v0  ;;  %v5471_v0 = vld [vmem:[%s7565_s8] ss:$28 sps:$4 sm:$0xff]  }
 0x22b   : > { %v4975_v3 = vpop.f32.mrf.mxu0  ;;  %v5474_v1 = vld [vmem:[%s7565_s8 + $0x380] ss:$28 sps:$4 sm:$0xff]  }
 0x22c   : > { %v2264_v12 = vadd.f32 %v4974_v2, %v4674_v4  ;;  %v5479_v2 = vld [vmem:[%s7565_s8 + $0x34c] ss:$28 sps:$4 sm:$0xff]  }
 0x22d   : > { %v4976_v16 = vpop.f32.mrf.mxu0  ;;  %v5482_v3 = vld [vmem:[%s7565_s8 + $0x6cc] ss:$28 sps:$4 sm:$0xff]  }
 0x22e   : > { %v5477_v16 = vld [vmem:[%s7565_s8 + $0x348] ss:$28 sps:$4 sm:$0xff]  }
 0x22f   : > { %v5480_v4 = vld [vmem:[%s7565_s8 + $0x6c8] ss:$28 sps:$4 sm:$0xff]  }
 0x270   : > { %v4994_v7 = vpop.f32.mrf.mxu1 }
 0x272   : > { %v4995_v11 = vpop.f32.mrf.mxu1 }
 0x273   : > { %v4996_v13 = vadd.f32 %v4995_v11, %v4994_v7  ;;  %v5485_v7 = vld [vmem:[%s7565_s8 + $0x314] ss:$28 sps:$4 sm:$0xff]  }
 0x274   : > { %v4997_v14 = vpop.f32.mrf.mxu1  ;;  %v5488_v11 = vld [vmem:[%s7565_s8 + $0x694] ss:$28 sps:$4 sm:$0xff]  }
 0x275   : > { %v2304_v15 = vadd.f32 %v4996_v13, %v2264_v12  ;;  %v5483_v12 = vld [vmem:[%s7565_s8 + $0x310] ss:$28 sps:$4 sm:$0xff]   ;;  %v5491_v14 = vld [vmem:[%s7565_s8 + $0x2dc] ss:$28 sps:$4 sm:$0xff]  }
 0x276   : > { %v4998_v17 = vpop.f32.mrf.mxu1  ;;  %v5486_v13 = vld [vmem:[%s7565_s8 + $0x690] ss:$28 sps:$4 sm:$0xff]  }
 0x277   : > { %v2310_v18 = vmul.f32 0.5, %v2304_v15  ;;  %4332 = vst [vmem:[%s6754_s24] sm:$0xff] %v2304_v15  ;;  %v5489_v17 = vld [vmem:[%s7565_s8 + $0x2d8] ss:$28 sps:$4 sm:$0xff]  }
 0x279   : > { %v2311_v23 = vmul.f32 1.442695, %v2310_v18  ;;  %v5492_v18 = vld [vmem:[%s7565_s8 + $0x658] ss:$28 sps:$4 sm:$0xff]  }
 0x27b   : > { %5749 = vpow2.f32 %v2311_v23  ;;  %v5495_v23 = vld [vmem:[%s7565_s8 + $0x2a0] ss:$28 sps:$4 sm:$0xff]  }
 0x288   : > { %v5750_v31 = vpop.eup %5749 }
 0x289   : > { %2314 = vrot.lane.b32.xlu0 %v5750_v31, %s5872_s26  ;;  %v5510_v31 = vld [vmem:[%s7565_s8 + $0x5b0] ss:$28 sps:$4 sm:$0xff]   ;;  %s5873_s26 = smov [#allocation4]  }
 0x28a   : > { %s5783_s13 = sshll.u32 %s5873_s26, 4  ;;  %s5784_s13 = int_to_ptr.vmem [resolvable:$false] %s5783_s13 }
 0x28b   : > { %s5785_s14 = scalar_lea.vmem %s5784_s13, 256  ;;  %p5786_p0 = scmp.lt.s32.totalorder %s4367_s25, %s5784_s13 }
 0x28c   : > { %p5787_p1 = scmp.lt.s32.totalorder %s5785_s14, %s5779_s12 }
 0x28e   : > { %p5788_p2 = por %p5787_p1, %p5786_p0 }
 0x290   : > { %p5789_p3 = pnand %p5788_p2, %p5782_p13 }
 0x2fb   : > { %v2315_v52 = vpop.permute.xlu0 %2314 }
 0x2fc   : > { %v2317_v19 = vmul.f32 %v2315_v52, %v2309_v32  ;;  %v5515_v32 = vld [vmem:[%s7565_s8 + $0x1fc] ss:$28 sps:$4 sm:$0xff]  }
 0x2fd   : > { %v5518_v52 = vld [vmem:[%s7565_s8 + $0x57c] ss:$28 sps:$4 sm:$0xff]  }
 0x2fe   : > { %v2318_v34 = vadd.f32 %v2317_v19, %v2304_v15  ;;  %v5494_v15 = vld [vmem:[%s7565_s8 + $0x65c] ss:$28 sps:$4 sm:$0xff]  }
 0x2ff   : > { %v5513_v19 = vld [vmem:[%s7565_s8 + $0x1f8] ss:$28 sps:$4 sm:$0xff]  }
 0x300   : > { %v2319_v37 = vpack.c.bf16 %v2318_v34, %v2318_v34  ;;  %v5516_v34 = vld [vmem:[%s7565_s8 + $0x578] ss:$28 sps:$4 sm:$0xff]  }
 0x302   : > { %4716 = vmatmul.mubr.msk.bf16.vlgmr.msra.gmra.mxu0 %vm2378_vm2, %v2319_v37  ;;  %4718 = vmatmul.mubr.msk.bf16.vlgmr.msra.gmra.mxu1 %vm2378_vm2, %v2319_v37  ;;  %v5519_v37 = vld [vmem:[%s7565_s8 + $0x1c0] ss:$28 sps:$4 sm:$0xff]  }
 0x303   : > { %3931 = vmatpush1.bf16.msra.mxu0 %v5429_v35  ;;  %3972 = vmatpush1.bf16.msra.mxu1 %v5432_v8  ;;  %v5521_v35 = vld [vmem:[%s7565_s8 + $0x1c4] ss:$28 sps:$4 sm:$0xff]  }
 0x304   : > { %3932 = vmatprep.subr.bf16.mxu0 %v5437_v38  ;;  %3973 = vmatprep.subr.bf16.mxu1 %v5440_v39  ;;  %v5524_v8 = vld [vmem:[%s7565_s8 + $0x544] ss:$28 sps:$4 sm:$0xff]   ;;  %v5527_v39 = vld [vmem:[%s7565_s8 + $0x194] ss:$28 sps:$4 sm:$0xff]  }
 0x305   : > { %v5522_v38 = vld [vmem:[%s7565_s8 + $0x540] ss:$28 sps:$4 sm:$0xff]  }
 0x307   : > { %3933 = vmatpush1.bf16.msra.mxu0 %v5435_v36  ;;  %3974 = vmatpush1.bf16.msra.mxu1 %v5438_v40  ;;  %v5530_v36 = vld [vmem:[%s7565_s8 + $0x514] ss:$28 sps:$4 sm:$0xff]   ;;  %v2326_v40 = vld [vmem:[%s7564_s7] sm:$0xf] }
 0x308   : > { %3934 = vmatprep.subr.bf16.mxu0 %v5443_v41  ;;  %3975 = vmatprep.subr.bf16.mxu1 %v5446_v42  ;;  %v2331_v41 = vrot.slane %v2326_v40, %v6719_v6  ;;  %v2339_v42 = vrot.slane %v2326_v40, %v6731_v20 }
 0x30b   : > { %3935 = vmatpush1.bf16.msra.mxu0 %v5441_v43  ;;  %3976 = vmatpush1.bf16.msra.mxu1 %v5444_v44  ;;  %v2335_v43 = vrot.slane %v2326_v40, %v6725_v10  ;;  %v2343_v44 = vrot.slane %v2326_v40, %v6734_v33  ;;  %v5581_v40 = vld [vmem:[%s7565_s8 + $0x31c] ss:$28 sps:$4 sm:$0xff]  }
 0x30c   : > { %3936 = vmatprep.subr.bf16.mxu0 %v5449_v45  ;;  %3977 = vmatprep.subr.bf16.mxu1 %v5452_v46 }
 0x30f   : > { %3937 = vmatpush1.bf16.msra.mxu0 %v5447_v47  ;;  %3978 = vmatpush1.bf16.msra.mxu1 %v5450_v48 }
 0x310   : > { %3938 = vmatprep.subr.bf16.mxu0 %v5455_v49  ;;  %3979 = vmatprep.subr.bf16.mxu1 %v5458_v50 }
 0x313   : > { %3939 = vmatpush1.bf16.msra.mxu0 %v5453_v51  ;;  %3980 = vmatpush1.bf16.msra.mxu1 %v5456_v53 }
 0x314   : > { %3940 = vmatprep.subr.bf16.mxu0 %v5461_v54  ;;  %3981 = vmatprep.subr.bf16.mxu1 %v5464_v55 }
 0x317   : > { %3941 = vmatpush1.bf16.msra.mxu0 %v5459_v56  ;;  %3982 = vmatpush1.bf16.msra.mxu1 %v5462_v57 }
 0x318   : > { %3942 = vmatprep.subr.bf16.mxu0 %v5467_v58  ;;  %3983 = vmatprep.subr.bf16.mxu1 %v5470_v59 }
 0x31b   : > { %3943 = vmatpush1.bf16.msra.mxu0 %v5465_v60  ;;  %3984 = vmatpush1.bf16.msra.mxu1 %v5468_v61 }
 0x31c   : > { %3944 = vmatprep.subr.bf16.mxu0 %v5473_v62  ;;  %3985 = vmatprep.subr.bf16.mxu1 %v5476_v63 }
 0x31f   : > { %3945 = vmatpush1.bf16.msra.mxu0 %v5471_v0  ;;  %3986 = vmatpush1.bf16.msra.mxu1 %v5474_v1  ;;  %v5525_v0 = vld [vmem:[%s7565_s8 + $0x190] ss:$28 sps:$4 sm:$0xff]  }
 0x320   : > { %3946 = vmatprep.subr.bf16.mxu0 %v5479_v2  ;;  %3987 = vmatprep.subr.bf16.mxu1 %v5482_v3  ;;  %v5528_v1 = vld [vmem:[%s7565_s8 + $0x510] ss:$28 sps:$4 sm:$0xff]  }
 0x323   : > { %3947 = vmatpush2.bf16.msra.mxu0 %v5477_v16  ;;  %3988 = vmatpush2.bf16.msra.mxu1 %v5480_v4  ;;  %v5533_v16 = vld [vmem:[%s7565_s8 + $0x15c] ss:$28 sps:$4 sm:$0xff]  }
 0x324   : > { %3948 = vmatprep.subr.bf16.mxu0 %v5485_v7  ;;  %3989 = vmatprep.subr.bf16.mxu1 %v5488_v11  ;;  %v5536_v4 = vld [vmem:[%s7565_s8 + $0x4dc] ss:$28 sps:$4 sm:$0xff]  }
 0x325   : > { %v5531_v7 = vld [vmem:[%s7565_s8 + $0x158] ss:$28 sps:$4 sm:$0xff]  }
 0x326   : > { %v5534_v11 = vld [vmem:[%s7565_s8 + $0x4d8] ss:$28 sps:$4 sm:$0xff]  }
 0x327   : > { %3949 = vmatpush2.bf16.msra.mxu0 %v5483_v12  ;;  %3990 = vmatpush2.bf16.msra.mxu1 %v5486_v13  ;;  %v5539_v12 = vld [vmem:[%s7565_s8 + $0x124] ss:$28 sps:$4 sm:$0xff]  }
 0x328   : > { %3950 = vmatprep.subr.bf16.mxu0 %v5491_v14  ;;  %3991 = vmatprep.subr.bf16.mxu1 %v5494_v15  ;;  %v5542_v13 = vld [vmem:[%s7565_s8 + $0x4a4] ss:$28 sps:$4 sm:$0xff]  }
 0x329   : > { %v5537_v14 = vld [vmem:[%s7565_s8 + $0x120] ss:$28 sps:$4 sm:$0xff]  }
 0x32a   : > { %v5540_v15 = vld [vmem:[%s7565_s8 + $0x4a0] ss:$28 sps:$4 sm:$0xff]  }
 0x32b   : > { %3951 = vmatpush2.bf16.msra.mxu0 %v5489_v17  ;;  %3992 = vmatpush2.bf16.msra.mxu1 %v5492_v18  ;;  %v5545_v17 = vld [vmem:[%s7565_s8 + $0xec] ss:$28 sps:$4 sm:$0xff]  }
 0x32c   : > { %3952 = vmatprep.subr.bf16.mxu0 %v5497_v21  ;;  %3993 = vmatprep.subr.bf16.mxu1 %v5500_v22  ;;  %v5548_v18 = vld [vmem:[%s7565_s8 + $0x46c] ss:$28 sps:$4 sm:$0xff]  }
 0x32d   : > { %v5543_v21 = vld [vmem:[%s7565_s8 + $0xe8] ss:$28 sps:$4 sm:$0xff]  }
 0x32e   : > { %v5546_v22 = vld [vmem:[%s7565_s8 + $0x468] ss:$28 sps:$4 sm:$0xff]  }
 0x32f   : > { %3953 = vmatpush2.bf16.msra.mxu0 %v5495_v23  ;;  %3994 = vmatpush2.bf16.msra.mxu1 %v5498_v24  ;;  %v5551_v23 = vld [vmem:[%s7565_s8 + $0xb4] ss:$28 sps:$4 sm:$0xff]  }
 0x330   : > { %3954 = vmatprep.subr.bf16.mxu0 %v5503_v25  ;;  %3995 = vmatprep.subr.bf16.mxu1 %v5506_v26  ;;  %v5554_v24 = vld [vmem:[%s7565_s8 + $0x434] ss:$28 sps:$4 sm:$0xff]  }
 0x331   : > { %v5549_v25 = vld [vmem:[%s7565_s8 + $0xb0] ss:$28 sps:$4 sm:$0xff]  }
 0x332   : > { %v5552_v26 = vld [vmem:[%s7565_s8 + $0x430] ss:$28 sps:$4 sm:$0xff]  }
 0x333   : > { %3955 = vmatpush2.bf16.msra.mxu0 %v5501_v27  ;;  %3996 = vmatpush2.bf16.msra.mxu1 %v5504_v28  ;;  %v5557_v27 = vld [vmem:[%s7565_s8 + $0x7c] ss:$28 sps:$4 sm:$0xff]  }
 0x334   : > { %3956 = vmatprep.subr.bf16.mxu0 %v5509_v29  ;;  %3997 = vmatprep.subr.bf16.mxu1 %v5512_v30  ;;  %v5560_v28 = vld [vmem:[%s7565_s8 + $0x3fc] ss:$28 sps:$4 sm:$0xff]  }
 0x335   : > { %v5555_v29 = vld [vmem:[%s7565_s8 + $0x78] ss:$28 sps:$4 sm:$0xff]  }
 0x336   : > { %v5558_v30 = vld [vmem:[%s7565_s8 + $0x3f8] ss:$28 sps:$4 sm:$0xff]  }
 0x337   : > { %3957 = vmatpush2.bf16.msra.mxu0 %v5507_v9  ;;  %3998 = vmatpush2.bf16.msra.mxu1 %v5510_v31  ;;  %v5563_v9 = vld [vmem:[%s7565_s8 + $0x44] ss:$28 sps:$4 sm:$0xff]  }
 0x338   : > { %3958 = vmatprep.subr.bf16.mxu0 %v5515_v32  ;;  %3999 = vmatprep.subr.bf16.mxu1 %v5518_v52  ;;  %v5566_v31 = vld [vmem:[%s7565_s8 + $0x3c4] ss:$28 sps:$4 sm:$0xff]  }
 0x339   : > { %v5561_v32 = vld [vmem:[%s7565_s8 + $0x40] ss:$28 sps:$4 sm:$0xff]  }
 0x33a   : > { %v5564_v52 = vld [vmem:[%s7565_s8 + $0x3c0] ss:$28 sps:$4 sm:$0xff]  }
 0x33b   : > { %3959 = vmatpush2.bf16.msra.mxu0 %v5513_v19  ;;  %4000 = vmatpush2.bf16.msra.mxu1 %v5516_v34  ;;  %v5569_v19 = vld [vmem:[%s7565_s8 + $0xc] ss:$28 sps:$4 sm:$0xff]  }
 0x33c   : > { %3960 = vmatprep.subr.bf16.mxu0 %v5521_v35  ;;  %4001 = vmatprep.subr.bf16.mxu1 %v5524_v8  ;;  %v5572_v34 = vld [vmem:[%s7565_s8 + $0x38c] ss:$28 sps:$4 sm:$0xff]  }
 0x33d   : > { %v5567_v35 = vld [vmem:[%s7565_s8 + $0x8] ss:$28 sps:$4 sm:$0xff]  }
 0x33e   : > { %v5570_v8 = vld [vmem:[%s7565_s8 + $0x388] ss:$28 sps:$4 sm:$0xff]  }
 0x33f   : > { %3961 = vmatpush2.bf16.msra.mxu0 %v5519_v37  ;;  %4002 = vmatpush2.bf16.msra.mxu1 %v5522_v38  ;;  %v5575_v37 = vld [vmem:[%s7565_s8 + $0x354] ss:$28 sps:$4 sm:$0xff]  }
 0x340   : > { %4012 = vmatprep.subr.bf16.mxu0 %v5527_v39  ;;  %4053 = vmatprep.subr.bf16.mxu1 %v5530_v36  ;;  %v5578_v38 = vld [vmem:[%s7565_s8 + $0x6d4] ss:$28 sps:$4 sm:$0xff]  }
 0x341   : > { %v5573_v39 = vld [vmem:[%s7565_s8 + $0x350] ss:$28 sps:$4 sm:$0xff]  }
 0x342   : > { %v5576_v36 = vld [vmem:[%s7565_s8 + $0x6d0] ss:$28 sps:$4 sm:$0xff]  }
 0x3c2   : > { %v2429_v45 = vpop.f32.mrf.mxu0  ;;  %v2470_v46 = vpop.f32.mrf.mxu1 }
 0x3c3   : > { %v2430_v47 = vadd.f32 %v2429_v45, %v2331_v41  ;;  %v2471_v48 = vadd.f32 %v2470_v46, %v2339_v42  ;;  %v5584_v41 = vld [vmem:[%s7565_s8 + $0x69c] ss:$28 sps:$4 sm:$0xff]   ;;  %v5590_v45 = vld [vmem:[%s7565_s8 + $0x664] ss:$28 sps:$4 sm:$0xff]  }
 0x3c4   : > { %v2431_v49 = vpop.f32.mrf.mxu0  ;;  %v2472_v50 = vpop.f32.mrf.mxu1  ;;  %v5579_v42 = vld [vmem:[%s7565_s8 + $0x318] ss:$28 sps:$4 sm:$0xff]   ;;  %v5585_v46 = vld [vmem:[%s7565_s8 + $0x2e0] ss:$28 sps:$4 sm:$0xff]  }
 0x3c5   : > { %v2432_v51 = vadd.f32 %v2431_v49, %v2335_v43  ;;  %v2473_v53 = vadd.f32 %v2472_v50, %v2343_v44  ;;  %v2477_v54 = vmax.f32 %v2430_v47, 0.0  ;;  %v2479_v55 = vmax.f32 %v2471_v48, 0.0  ;;  %v5582_v43 = vld [vmem:[%s7565_s8 + $0x698] ss:$28 sps:$4 sm:$0xff]   ;;  %v5587_v44 = vld [vmem:[%s7565_s8 + $0x2e4] ss:$28 sps:$4 sm:$0xff]  }
 0x3c6   : > { %v2433_v56 = vpop.f32.mrf.mxu0  ;;  %v2474_v57 = vpop.f32.mrf.mxu1  ;;  %v5588_v47 = vld [vmem:[%s7565_s8 + $0x660] ss:$28 sps:$4 sm:$0xff]   ;;  %v5593_v48 = vld [vmem:[%s7565_s8 + $0x2ac] ss:$28 sps:$4 sm:$0xff]  }
 0x3c7   : > { %v2478_v58 = vmax.f32 %v2432_v51, 0.0  ;;  %v2480_v59 = vmax.f32 %v2473_v53, 0.0  ;;  %v6990_v2 = vpack.c.bf16 %v2477_v54, %v2477_v54  ;;  %v6992_v3 = vpack.c.bf16 %v2479_v55, %v2479_v55  ;;  %v5596_v49 = vld [vmem:[%s7565_s8 + $0x62c] ss:$28 sps:$4 sm:$0xff]   ;;  %v5599_v53 = vld [vmem:[%s7565_s8 + $0x274] ss:$28 sps:$4 sm:$0xff]  }
 0x3c8   : > { %v2434_v60 = vpop.f32.mrf.mxu0  ;;  %v2475_v61 = vpop.f32.mrf.mxu1  ;;  %v5591_v50 = vld [vmem:[%s7565_s8 + $0x2a8] ss:$28 sps:$4 sm:$0xff]   ;;  %v5602_v54 = vld [vmem:[%s7565_s8 + $0x5f4] ss:$28 sps:$4 sm:$0xff]   ;;  %v5605_v57 = vld [vmem:[%s7565_s8 + $0x23c] ss:$28 sps:$4 sm:$0xff]  }
 0x3c9   : > { %v6980_v62 = vpack.c.bf16 %v2478_v58, %v2478_v58  ;;  %v6982_v63 = vpack.c.bf16 %v2480_v59, %v2480_v59  ;;  %v5594_v51 = vld [vmem:[%s7565_s8 + $0x628] ss:$28 sps:$4 sm:$0xff]   ;;  %v5597_v55 = vld [vmem:[%s7565_s8 + $0x270] ss:$28 sps:$4 sm:$0xff]   ;;  %v5608_v58 = vld [vmem:[%s7565_s8 + $0x5bc] ss:$28 sps:$4 sm:$0xff]  }
 0x3ca   : > { %v5600_v56 = vld [vmem:[%s7565_s8 + $0x5f0] ss:$28 sps:$4 sm:$0xff]   ;;  %v5603_v59 = vld [vmem:[%s7565_s8 + $0x238] ss:$28 sps:$4 sm:$0xff]   ;;  %v5611_v61 = vld [vmem:[%s7565_s8 + $0x204] ss:$28 sps:$4 sm:$0xff]  }
 0x3cb   : > { %3962 = vmatprep.mubr.bf16.mxu0 %v6980_v62  ;;  %4003 = vmatprep.mubr.bf16.mxu1 %v6982_v63  ;;  %v5606_v60 = vld [vmem:[%s7565_s8 + $0x5b8] ss:$28 sps:$4 sm:$0xff]  }
 0x3cc   : > { %3963 = vmatmul.mubr.bf16.vlgmr.msra.gmra.mxu0 %v6990_v2  ;;  %4004 = vmatmul.mubr.bf16.vlgmr.msra.gmra.mxu1 %v6992_v3 }
 0x3cd   : > { %4013 = vmatpush1.bf16.msra.mxu0 %v5525_v0  ;;  %4054 = vmatpush1.bf16.msra.mxu1 %v5528_v1  ;;  %v5614_v0 = vld [vmem:[%s7565_s8 + $0x584] ss:$28 sps:$4 sm:$0xff]  }
 0x3ce   : > { %4044 = vmatprep.mubr.bf16.mxu0 %v6980_v62  ;;  %4085 = vmatprep.mubr.bf16.mxu1 %v6982_v63  ;;  %v5609_v1 = vld [vmem:[%s7565_s8 + $0x200] ss:$28 sps:$4 sm:$0xff]  }
 0x3cf   : > { %4014 = vmatprep.subr.bf16.mxu0 %v5533_v16  ;;  %4055 = vmatprep.subr.bf16.mxu1 %v5536_v4  ;;  %v5612_v16 = vld [vmem:[%s7565_s8 + $0x580] ss:$28 sps:$4 sm:$0xff]   ;;  %v5617_v4 = vld [vmem:[%s7565_s8 + $0x1cc] ss:$28 sps:$4 sm:$0xff]  }
 0x3d1   : > { %4015 = vmatpush1.bf16.msra.mxu0 %v5531_v7  ;;  %4056 = vmatpush1.bf16.msra.mxu1 %v5534_v11  ;;  %v5620_v7 = vld [vmem:[%s7565_s8 + $0x54c] ss:$28 sps:$4 sm:$0xff]  }
 0x3d2   : > { %4016 = vmatprep.subr.bf16.mxu0 %v5539_v12  ;;  %4057 = vmatprep.subr.bf16.mxu1 %v5542_v13  ;;  %v5615_v11 = vld [vmem:[%s7565_s8 + $0x1c8] ss:$28 sps:$4 sm:$0xff]   ;;  %v5623_v13 = vld [vmem:[%s7565_s8 + $0x19c] ss:$28 sps:$4 sm:$0xff]  }
 0x3d3   : > { %v5618_v12 = vld [vmem:[%s7565_s8 + $0x548] ss:$28 sps:$4 sm:$0xff]  }
 0x3d5   : > { %4017 = vmatpush1.bf16.msra.mxu0 %v5537_v14  ;;  %4058 = vmatpush1.bf16.msra.mxu1 %v5540_v15  ;;  %v5626_v14 = vld [vmem:[%s7565_s8 + $0x51c] ss:$28 sps:$4 sm:$0xff]  }
 0x3d6   : > { %4018 = vmatprep.subr.bf16.mxu0 %v5545_v17  ;;  %4059 = vmatprep.subr.bf16.mxu1 %v5548_v18  ;;  %v5621_v15 = vld [vmem:[%s7565_s8 + $0x198] ss:$28 sps:$4 sm:$0xff]   ;;  %v5629_v18 = vld [vmem:[%s7565_s8 + $0x164] ss:$28 sps:$4 sm:$0xff]  }
 0x3d7   : > { %v5624_v17 = vld [vmem:[%s7565_s8 + $0x518] ss:$28 sps:$4 sm:$0xff]  }
 0x3d9   : > { %4019 = vmatpush1.bf16.msra.mxu0 %v5543_v21  ;;  %4060 = vmatpush1.bf16.msra.mxu1 %v5546_v22  ;;  %v5632_v21 = vld [vmem:[%s7565_s8 + $0x4e4] ss:$28 sps:$4 sm:$0xff]  }
 0x3da   : > { %4020 = vmatprep.subr.bf16.mxu0 %v5551_v23  ;;  %4061 = vmatprep.subr.bf16.mxu1 %v5554_v24  ;;  %v5627_v22 = vld [vmem:[%s7565_s8 + $0x160] ss:$28 sps:$4 sm:$0xff]   ;;  %v5635_v24 = vld [vmem:[%s7565_s8 + $0x12c] ss:$28 sps:$4 sm:$0xff]  }
 0x3db   : > { %v5630_v23 = vld [vmem:[%s7565_s8 + $0x4e0] ss:$28 sps:$4 sm:$0xff]  }
 0x3dd   : > { %4021 = vmatpush1.bf16.msra.mxu0 %v5549_v25  ;;  %4062 = vmatpush1.bf16.msra.mxu1 %v5552_v26  ;;  %v5638_v25 = vld [vmem:[%s7565_s8 + $0x4ac] ss:$28 sps:$4 sm:$0xff]  }
 0x3de   : > { %4022 = vmatprep.subr.bf16.mxu0 %v5557_v27  ;;  %4063 = vmatprep.subr.bf16.mxu1 %v5560_v28  ;;  %v5633_v26 = vld [vmem:[%s7565_s8 + $0x128] ss:$28 sps:$4 sm:$0xff]   ;;  %v5641_v28 = vld [vmem:[%s7565_s8 + $0xf4] ss:$28 sps:$4 sm:$0xff]  }
 0x3df   : > { %v5636_v27 = vld [vmem:[%s7565_s8 + $0x4a8] ss:$28 sps:$4 sm:$0xff]  }
 0x3e1   : > { %4023 = vmatpush1.bf16.msra.mxu0 %v5555_v29  ;;  %4064 = vmatpush1.bf16.msra.mxu1 %v5558_v30  ;;  %v5644_v29 = vld [vmem:[%s7565_s8 + $0x474] ss:$28 sps:$4 sm:$0xff]  }
 0x3e2   : > { %4024 = vmatprep.subr.bf16.mxu0 %v5563_v9  ;;  %4065 = vmatprep.subr.bf16.mxu1 %v5566_v31  ;;  %v5639_v30 = vld [vmem:[%s7565_s8 + $0xf0] ss:$28 sps:$4 sm:$0xff]   ;;  %v5647_v31 = vld [vmem:[%s7565_s8 + $0xbc] ss:$28 sps:$4 sm:$0xff]  }
 0x3e3   : > { %v5642_v9 = vld [vmem:[%s7565_s8 + $0x470] ss:$28 sps:$4 sm:$0xff]  }
 0x3e5   : > { %4025 = vmatpush1.bf16.msra.mxu0 %v5561_v32  ;;  %4066 = vmatpush1.bf16.msra.mxu1 %v5564_v52  ;;  %v5650_v32 = vld [vmem:[%s7565_s8 + $0x43c] ss:$28 sps:$4 sm:$0xff]  }
 0x3e6   : > { %4026 = vmatprep.subr.bf16.mxu0 %v5569_v19  ;;  %4067 = vmatprep.subr.bf16.mxu1 %v5572_v34  ;;  %v5645_v52 = vld [vmem:[%s7565_s8 + $0xb8] ss:$28 sps:$4 sm:$0xff]   ;;  %v5653_v34 = vld [vmem:[%s7565_s8 + $0x84] ss:$28 sps:$4 sm:$0xff]  }
 0x3e7   : > { %v5648_v19 = vld [vmem:[%s7565_s8 + $0x438] ss:$28 sps:$4 sm:$0xff]  }
 0x3e9   : > { %4027 = vmatpush1.bf16.msra.mxu0 %v5567_v35  ;;  %4068 = vmatpush1.bf16.msra.mxu1 %v5570_v8  ;;  %v5656_v35 = vld [vmem:[%s7565_s8 + $0x404] ss:$28 sps:$4 sm:$0xff]  }
 0x3ea   : > { %4028 = vmatprep.subr.bf16.mxu0 %v5575_v37  ;;  %4069 = vmatprep.subr.bf16.mxu1 %v5578_v38  ;;  %v5651_v8 = vld [vmem:[%s7565_s8 + $0x80] ss:$28 sps:$4 sm:$0xff]   ;;  %v5659_v38 = vld [vmem:[%s7565_s8 + $0x4c] ss:$28 sps:$4 sm:$0xff]  }
 0x3eb   : > { %v5654_v37 = vld [vmem:[%s7565_s8 + $0x400] ss:$28 sps:$4 sm:$0xff]  }
 0x3ed   : > { %4029 = vmatpush2.bf16.msra.mxu0 %v5573_v39  ;;  %4070 = vmatpush2.bf16.msra.mxu1 %v5576_v36  ;;  %v5662_v39 = vld [vmem:[%s7565_s8 + $0x3cc] ss:$28 sps:$4 sm:$0xff]  }
 0x3ee   : > { %4030 = vmatprep.subr.bf16.mxu0 %v5581_v40  ;;  %4071 = vmatprep.subr.bf16.mxu1 %v5584_v41  ;;  %v5657_v36 = vld [vmem:[%s7565_s8 + $0x48] ss:$28 sps:$4 sm:$0xff]   ;;  %v5665_v41 = vld [vmem:[%s7565_s8 + $0x14] ss:$28 sps:$4 sm:$0xff]  }
 0x3ef   : > { %v5660_v40 = vld [vmem:[%s7565_s8 + $0x3c8] ss:$28 sps:$4 sm:$0xff]  }
 0x3f1   : > { %4031 = vmatpush2.bf16.msra.mxu0 %v5579_v42  ;;  %4072 = vmatpush2.bf16.msra.mxu1 %v5582_v43  ;;  %v5668_v42 = vld [vmem:[%s7565_s8 + $0x394] ss:$28 sps:$4 sm:$0xff]  }
 0x3f2   : > { %4032 = vmatprep.subr.bf16.mxu0 %v5587_v44  ;;  %4073 = vmatprep.subr.bf16.mxu1 %v5590_v45  ;;  %v5663_v43 = vld [vmem:[%s7565_s8 + $0x10] ss:$28 sps:$4 sm:$0xff]   ;;  %v5671_v45 = vld [vmem:[%s7565_s8 + $0x35c] ss:$28 sps:$4 sm:$0xff]  }
 0x3f3   : > { %v5666_v44 = vld [vmem:[%s7565_s8 + $0x390] ss:$28 sps:$4 sm:$0xff]  }
 0x3f5   : > { %4033 = vmatpush2.bf16.msra.mxu0 %v5585_v46  ;;  %4074 = vmatpush2.bf16.msra.mxu1 %v5588_v47  ;;  %v5674_v46 = vld [vmem:[%s7565_s8 + $0x6dc] ss:$28 sps:$4 sm:$0xff]  }
 0x3f6   : > { %4034 = vmatprep.subr.bf16.mxu0 %v5593_v48  ;;  %4075 = vmatprep.subr.bf16.mxu1 %v5596_v49  ;;  %v5669_v47 = vld [vmem:[%s7565_s8 + $0x358] ss:$28 sps:$4 sm:$0xff]   ;;  %v5677_v49 = vld [vmem:[%s7565_s8 + $0x324] ss:$28 sps:$4 sm:$0xff]  }
 0x3f7   : > { %v5672_v48 = vld [vmem:[%s7565_s8 + $0x6d8] ss:$28 sps:$4 sm:$0xff]  }
 0x3f9   : > { %4035 = vmatpush2.bf16.msra.mxu0 %v5591_v50  ;;  %4076 = vmatpush2.bf16.msra.mxu1 %v5594_v51  ;;  %v5680_v50 = vld [vmem:[%s7565_s8 + $0x6a4] ss:$28 sps:$4 sm:$0xff]  }
 0x3fa   : > { %4036 = vmatprep.subr.bf16.mxu0 %v5599_v53  ;;  %4077 = vmatprep.subr.bf16.mxu1 %v5602_v54  ;;  %v5675_v51 = vld [vmem:[%s7565_s8 + $0x320] ss:$28 sps:$4 sm:$0xff]   ;;  %v5683_v54 = vld [vmem:[%s7565_s8 + $0x2ec] ss:$28 sps:$4 sm:$0xff]  }
 0x3fb   : > { %v5678_v53 = vld [vmem:[%s7565_s8 + $0x6a0] ss:$28 sps:$4 sm:$0xff]  }
 0x3fd   : > { %4037 = vmatpush2.bf16.msra.mxu0 %v5597_v55  ;;  %4078 = vmatpush2.bf16.msra.mxu1 %v5600_v56  ;;  %v5686_v55 = vld [vmem:[%s7565_s8 + $0x66c] ss:$28 sps:$4 sm:$0xff]  }
 0x3fe   : > { %4038 = vmatprep.subr.bf16.mxu0 %v5605_v57  ;;  %4079 = vmatprep.subr.bf16.mxu1 %v5608_v58  ;;  %v5681_v56 = vld [vmem:[%s7565_s8 + $0x2e8] ss:$28 sps:$4 sm:$0xff]   ;;  %v5689_v58 = vld [vmem:[%s7565_s8 + $0x2b4] ss:$28 sps:$4 sm:$0xff]  }
 0x3ff   : > { %v5684_v57 = vld [vmem:[%s7565_s8 + $0x668] ss:$28 sps:$4 sm:$0xff]  }
 0x401   : > { %4039 = vmatpush2.bf16.msra.mxu0 %v5603_v59  ;;  %4080 = vmatpush2.bf16.msra.mxu1 %v5606_v60  ;;  %v5692_v59 = vld [vmem:[%s7565_s8 + $0x634] ss:$28 sps:$4 sm:$0xff]  }
 0x402   : > { %4040 = vmatprep.subr.bf16.mxu0 %v5611_v61  ;;  %4081 = vmatprep.subr.bf16.mxu1 %v5614_v0  ;;  %v5687_v60 = vld [vmem:[%s7565_s8 + $0x2b0] ss:$28 sps:$4 sm:$0xff]   ;;  %v5695_v0 = vld [vmem:[%s7565_s8 + $0x27c] ss:$28 sps:$4 sm:$0xff]  }
 0x403   : > { %v5690_v61 = vld [vmem:[%s7565_s8 + $0x630] ss:$28 sps:$4 sm:$0xff]  }
 0x405   : > { %4041 = vmatpush2.bf16.msra.mxu0 %v5609_v1  ;;  %4082 = vmatpush2.bf16.msra.mxu1 %v5612_v16  ;;  %v5698_v1 = vld [vmem:[%s7565_s8 + $0x5fc] ss:$28 sps:$4 sm:$0xff]  }
 0x406   : > { %4042 = vmatprep.subr.bf16.mxu0 %v5617_v4  ;;  %4083 = vmatprep.subr.bf16.mxu1 %v5620_v7  ;;  %v5693_v16 = vld [vmem:[%s7565_s8 + $0x278] ss:$28 sps:$4 sm:$0xff]   ;;  %v5701_v7 = vld [vmem:[%s7565_s8 + $0x244] ss:$28 sps:$4 sm:$0xff]  }
 0x407   : > { %v5696_v4 = vld [vmem:[%s7565_s8 + $0x5f8] ss:$28 sps:$4 sm:$0xff]  }
 0x409   : > { %4043 = vmatpush2.bf16.msra.mxu0 %v5615_v11  ;;  %4084 = vmatpush2.bf16.msra.mxu1 %v5618_v12  ;;  %v5704_v11 = vld [vmem:[%s7565_s8 + $0x5c4] ss:$28 sps:$4 sm:$0xff]  }
 0x40a   : > { %4094 = vmatprep.subr.bf16.mxu0 %v5623_v13  ;;  %4135 = vmatprep.subr.bf16.mxu1 %v5626_v14  ;;  %v5699_v12 = vld [vmem:[%s7565_s8 + $0x240] ss:$28 sps:$4 sm:$0xff]   ;;  %v5707_v14 = vld [vmem:[%s7565_s8 + $0x20c] ss:$28 sps:$4 sm:$0xff]  }
 0x40b   : > { %v5702_v13 = vld [vmem:[%s7565_s8 + $0x5c0] ss:$28 sps:$4 sm:$0xff]  }
 0x40c   : > { %4045 = vmatmul.mubr.bf16.vlgmr.msra.gmra.mxu0 %v6990_v2  ;;  %4086 = vmatmul.mubr.bf16.vlgmr.msra.gmra.mxu1 %v6992_v3 }
 0x40d   : > { %4095 = vmatpush1.bf16.msra.mxu0 %v5621_v15  ;;  %4126 = vmatprep.mubr.bf16.mxu0 %v6980_v62  ;;  %v5710_v15 = vld [vmem:[%s7565_s8 + $0x58c] ss:$28 sps:$4 sm:$0xff]  }
 0x40e   : > { %4136 = vmatpush1.bf16.msra.mxu1 %v5624_v17  ;;  %4167 = vmatprep.mubr.bf16.mxu1 %v6982_v63  ;;  %v5705_v17 = vld [vmem:[%s7565_s8 + $0x208] ss:$28 sps:$4 sm:$0xff]  }
 0x40f   : > { %4096 = vmatprep.subr.bf16.mxu0 %v5629_v18  ;;  %4137 = vmatprep.subr.bf16.mxu1 %v5632_v21  ;;  %v5708_v18 = vld [vmem:[%s7565_s8 + $0x588] ss:$28 sps:$4 sm:$0xff]   ;;  %v5713_v21 = vld [vmem:[%s7565_s8 + $0x1d4] ss:$28 sps:$4 sm:$0xff]  }
 0x411   : > { %4097 = vmatpush1.bf16.msra.mxu0 %v5627_v22  ;;  %v5716_v22 = vld [vmem:[%s7565_s8 + $0x554] ss:$28 sps:$4 sm:$0xff]  }
 0x412   : > { %4138 = vmatpush1.bf16.msra.mxu1 %v5630_v23  ;;  %4098 = vmatprep.subr.bf16.mxu0 %v5635_v24  ;;  %v5711_v23 = vld [vmem:[%s7565_s8 + $0x1d0] ss:$28 sps:$4 sm:$0xff]  }
 0x413   : > { %4139 = vmatprep.subr.bf16.mxu1 %v5638_v25  ;;  %v5714_v24 = vld [vmem:[%s7565_s8 + $0x550] ss:$28 sps:$4 sm:$0xff]   ;;  %v5717_v25 = vld [vmem:[%s7565_s8 + $0x360] ss:$28 sps:$4 sm:$0xff]  }
 0x415   : > { %4099 = vmatpush1.bf16.msra.mxu0 %v5633_v26  ;;  %v5718_v26 = vld [vmem:[%s7565_s8 + $0x6e0] ss:$28 sps:$4 sm:$0xff]  }
 0x416   : > { %4140 = vmatpush1.bf16.msra.mxu1 %v5636_v27  ;;  %4100 = vmatprep.subr.bf16.mxu0 %v5641_v28  ;;  %v5719_v27 = vld [vmem:[%s7565_s8 + $0x1a0] ss:$28 sps:$4 sm:$0xff]  }
 0x417   : > { %4141 = vmatprep.subr.bf16.mxu1 %v5644_v29  ;;  %v5720_v28 = vld [vmem:[%s7565_s8 + $0x520] ss:$28 sps:$4 sm:$0xff]   ;;  %v5721_v29 = vld [vmem:[%s7565_s8 + $0x328] ss:$28 sps:$4 sm:$0xff]  }
 0x419   : > { %4101 = vmatpush1.bf16.msra.mxu0 %v5639_v30  ;;  %v5722_v30 = vld [vmem:[%s7565_s8 + $0x6a8] ss:$28 sps:$4 sm:$0xff]  }
 0x41a   : > { %4142 = vmatpush1.bf16.msra.mxu1 %v5642_v9  ;;  %4102 = vmatprep.subr.bf16.mxu0 %v5647_v31  ;;  %v5723_v9 = vld [vmem:[%s7565_s8 + $0x168] ss:$28 sps:$4 sm:$0xff]  }
 0x41b   : > { %4143 = vmatprep.subr.bf16.mxu1 %v5650_v32  ;;  %v5724_v31 = vld [vmem:[%s7565_s8 + $0x4e8] ss:$28 sps:$4 sm:$0xff]   ;;  %v5725_v32 = vld [vmem:[%s7565_s8 + $0x2f0] ss:$28 sps:$4 sm:$0xff]  }
 0x41d   : > { %4103 = vmatpush1.bf16.msra.mxu0 %v5645_v52  ;;  %v5726_v52 = vld [vmem:[%s7565_s8 + $0x670] ss:$28 sps:$4 sm:$0xff]  }
 0x41e   : > { %4144 = vmatpush1.bf16.msra.mxu1 %v5648_v19  ;;  %4104 = vmatprep.subr.bf16.mxu0 %v5653_v34  ;;  %v5728_v19 = vld [vmem:[%s7565_s8 + $0x4b0] ss:$28 sps:$4 sm:$0xff]   ;;  %v5730_v34 = vld [vmem:[%s7565_s8 + $0x638] ss:$28 sps:$4 sm:$0xff]  }
 0x41f   : > { %4145 = vmatprep.subr.bf16.mxu1 %v5656_v35  ;;  %v5731_v35 = vld [vmem:[%s7565_s8 + $0xf8] ss:$28 sps:$4 sm:$0xff]  }
 0x421   : > { %4105 = vmatpush1.bf16.msra.mxu0 %v5651_v8  ;;  %v5732_v8 = vld [vmem:[%s7565_s8 + $0x478] ss:$28 sps:$4 sm:$0xff]  }
 0x422   : > { %4146 = vmatpush1.bf16.msra.mxu1 %v5654_v37  ;;  %4106 = vmatprep.subr.bf16.mxu0 %v5659_v38  ;;  %v5733_v37 = vld [vmem:[%s7565_s8 + $0x280] ss:$28 sps:$4 sm:$0xff]  }
 0x423   : > { %4147 = vmatprep.subr.bf16.mxu1 %v5662_v39  ;;  %v5734_v38 = vld [vmem:[%s7565_s8 + $0x600] ss:$28 sps:$4 sm:$0xff]  }
 0x424   : > { %v5735_v39 = vld [vmem:[%s7565_s8 + $0xc0] ss:$28 sps:$4 sm:$0xff]  }
 0x425   : > { %4107 = vmatpush1.bf16.msra.mxu0 %v5657_v36  ;;  %v5736_v36 = vld [vmem:[%s7565_s8 + $0x440] ss:$28 sps:$4 sm:$0xff]  }
 0x426   : > { %4148 = vmatpush1.bf16.msra.mxu1 %v5660_v40  ;;  %4108 = vmatprep.subr.bf16.mxu0 %v5665_v41  ;;  %v5737_v40 = vld [vmem:[%s7565_s8 + $0x248] ss:$28 sps:$4 sm:$0xff]  }
 0x427   : > { %4149 = vmatprep.subr.bf16.mxu1 %v5668_v42  ;;  %v5738_v41 = vld [vmem:[%s7565_s8 + $0x5c8] ss:$28 sps:$4 sm:$0xff]  }
 0x428   : > { %v5739_v42 = vld [vmem:[%s7565_s8 + $0x88] ss:$28 sps:$4 sm:$0xff]  }
 0x429   : > { %4109 = vmatpush1.bf16.msra.mxu0 %v5663_v43  ;;  %v5740_v43 = vld [vmem:[%s7565_s8 + $0x408] ss:$28 sps:$4 sm:$0xff]  }
 0x42a   : > { %4150 = vmatpush1.bf16.msra.mxu1 %v5666_v44  ;;  %4110 = vmatprep.subr.bf16.mxu0 %v5671_v45  ;;  %v5741_v44 = vld [vmem:[%s7565_s8 + $0x210] ss:$28 sps:$4 sm:$0xff]  }
 0x42b   : > { %4151 = vmatprep.subr.bf16.mxu1 %v5674_v46  ;;  %v5742_v45 = vld [vmem:[%s7565_s8 + $0x590] ss:$28 sps:$4 sm:$0xff]  }
 0x42c   : > { %v5743_v46 = vld [vmem:[%s7565_s8 + $0x50] ss:$28 sps:$4 sm:$0xff]  }
 0x42d   : > { %4111 = vmatpush2.bf16.msra.mxu0 %v5669_v47  ;;  %v5744_v47 = vld [vmem:[%s7565_s8 + $0x3d0] ss:$28 sps:$4 sm:$0xff]  }
 0x42e   : > { %4152 = vmatpush2.bf16.msra.mxu1 %v5672_v48  ;;  %4112 = vmatprep.subr.bf16.mxu0 %v5677_v49  ;;  %v5745_v48 = vld [vmem:[%s7565_s8 + $0x1d8] ss:$28 sps:$4 sm:$0xff]  }
 0x42f   : > { %4153 = vmatprep.subr.bf16.mxu1 %v5680_v50  ;;  %v5746_v49 = vld [vmem:[%s7565_s8 + $0x558] ss:$28 sps:$4 sm:$0xff]  }
 0x430   : > { %v5747_v50 = vld [vmem:[%s7565_s8 + $0x18] ss:$28 sps:$4 sm:$0xff]  }
 0x431   : > { %4113 = vmatpush2.bf16.msra.mxu0 %v5675_v51  ;;  %v5748_v51 = vld [vmem:[%s7565_s8 + $0x398] ss:$28 sps:$4 sm:$0xff]  }
 0x432   : > { %4154 = vmatpush2.bf16.msra.mxu1 %v5678_v53  ;;  %4114 = vmatprep.subr.bf16.mxu0 %v5683_v54  ;;  %v7481_v53 = vld [vmem:[%s7566_s9] sm:$0x7f] }
 0x433   : > { %4155 = vmatprep.subr.bf16.mxu1 %v5686_v55  ;;  %v2746_v54 = vrot.slane %v7481_v53, %v6719_v6  ;;  %v2750_v55 = vrot.slane %v7481_v53, %v6725_v10 }
 0x435   : > { %4115 = vmatpush2.bf16.msra.mxu0 %v5681_v56 }
 0x436   : > { %4156 = vmatpush2.bf16.msra.mxu1 %v5684_v57  ;;  %4116 = vmatprep.subr.bf16.mxu0 %v5689_v58 }
 0x437   : > { %4157 = vmatprep.subr.bf16.mxu1 %v5692_v59 }
 0x439   : > { %4117 = vmatpush2.bf16.msra.mxu0 %v5687_v60 }
 0x43a   : > { %4158 = vmatpush2.bf16.msra.mxu1 %v5690_v61  ;;  %4118 = vmatprep.subr.bf16.mxu0 %v5695_v0 }
 0x43b   : > { %4159 = vmatprep.subr.bf16.mxu1 %v5698_v1 }
 0x43d   : > { %4119 = vmatpush2.bf16.msra.mxu0 %v5693_v16 }
 0x43e   : > { %4160 = vmatpush2.bf16.msra.mxu1 %v5696_v4  ;;  %4120 = vmatprep.subr.bf16.mxu0 %v5701_v7 }
 0x43f   : > { %4161 = vmatprep.subr.bf16.mxu1 %v5704_v11 }
 0x441   : > { %4121 = vmatpush2.bf16.msra.mxu0 %v5699_v12 }
 0x442   : > { %4162 = vmatpush2.bf16.msra.mxu1 %v5702_v13  ;;  %4122 = vmatprep.subr.bf16.mxu0 %v5707_v14 }
 0x443   : > { %4163 = vmatprep.subr.bf16.mxu1 %v5710_v15 }
 0x445   : > { %4123 = vmatpush2.bf16.msra.mxu0 %v5705_v17 }
 0x446   : > { %4164 = vmatpush2.bf16.msra.mxu1 %v5708_v18  ;;  %4124 = vmatprep.subr.bf16.mxu0 %v5713_v21 }
 0x447   : > { %4165 = vmatprep.subr.bf16.mxu1 %v5716_v22  ;;  %v2754_v22 = vrot.slane %v7481_v53, %v6731_v20 }
 0x449   : > { %4125 = vmatpush2.bf16.msra.mxu0 %v5711_v23  ;;  %v2758_v23 = vrot.slane %v7481_v53, %v6734_v33 }
 0x44a   : > { %4166 = vmatpush2.bf16.msra.mxu1 %v5714_v24  ;;  %5000 = vmatprep.subr.bf16.mxu0 %v5717_v25 }
 0x44b   : > { %5022 = vmatprep.subr.bf16.mxu1 %v5718_v26 }
 0x44c   : > { %4127 = vmatmul.mubr.bf16.vlgmr.msra.gmra.mxu0 %v6990_v2 }
 0x44d   : > { %4168 = vmatmul.mubr.bf16.vlgmr.msra.gmra.mxu1 %v6992_v3  ;;  %5001 = vmatpush3.bf16.msra.mxu0 %v5719_v27 }
 0x44e   : > { %4208 = vmatprep.mubr.bf16.mxu0 %v6980_v62  ;;  %5023 = vmatpush3.bf16.msra.mxu1 %v5720_v28  ;;  %v5727_v62 = vld [vmem:[%s7565_s8 + $0x130] ss:$28 sps:$4 sm:$0xff]  }
 0x44f   : > { %4248 = vmatprep.mubr.bf16.mxu1 %v6982_v63  ;;  %5002 = vmatprep.subr.bf16.mxu0 %v5721_v29  ;;  %v5729_v63 = vld [vmem:[%s7565_s8 + $0x2b8] ss:$28 sps:$4 sm:$0xff]  }
 0x450   : > { %5024 = vmatprep.subr.bf16.mxu1 %v5722_v30 }
 0x451   : > { %5003 = vmatpush3.bf16.msra.mxu0 %v5723_v9 }
 0x452   : > { %5025 = vmatpush3.bf16.msra.mxu1 %v5724_v31  ;;  %5004 = vmatprep.subr.bf16.mxu0 %v5725_v32 }
 0x453   : > { %5026 = vmatprep.subr.bf16.mxu1 %v5726_v52 }
 0x455   : > { %5005 = vmatpush3.bf16.msra.mxu0 %v5727_v62 }
 0x456   : > { %5027 = vmatpush3.bf16.msra.mxu1 %v5728_v19  ;;  %5006 = vmatprep.subr.bf16.mxu0 %v5729_v63 }
 0x457   : > { %5028 = vmatprep.subr.bf16.mxu1 %v5730_v34 }
 0x459   : > { %5007 = vmatpush3.bf16.msra.mxu0 %v5731_v35 }
 0x45a   : > { %5029 = vmatpush3.bf16.msra.mxu1 %v5732_v8  ;;  %5008 = vmatprep.subr.bf16.mxu0 %v5733_v37 }
 0x45b   : > { %5030 = vmatprep.subr.bf16.mxu1 %v5734_v38 }
 0x45d   : > { %5009 = vmatpush3.bf16.msra.mxu0 %v5735_v39 }
 0x45e   : > { %5031 = vmatpush3.bf16.msra.mxu1 %v5736_v36  ;;  %5010 = vmatprep.subr.bf16.mxu0 %v5737_v40 }
 0x45f   : > { %5032 = vmatprep.subr.bf16.mxu1 %v5738_v41 }
 0x461   : > { %5011 = vmatpush3.bf16.msra.mxu0 %v5739_v42 }
 0x462   : > { %5033 = vmatpush3.bf16.msra.mxu1 %v5740_v43  ;;  %5012 = vmatprep.subr.bf16.mxu0 %v5741_v44 }
 0x463   : > { %5034 = vmatprep.subr.bf16.mxu1 %v5742_v45 }
 0x465   : > { %5013 = vmatpush3.bf16.msra.mxu0 %v5743_v46 }
 0x466   : > { %5035 = vmatpush3.bf16.msra.mxu1 %v5744_v47  ;;  %5014 = vmatprep.subr.bf16.mxu0 %v5745_v48 }
 0x467   : > { %5036 = vmatprep.subr.bf16.mxu1 %v5746_v49 }
 0x469   : > { %5015 = vmatpush3.bf16.msra.mxu0 %v5747_v50 }
 0x46a   : > { %5037 = vmatpush3.bf16.msra.mxu1 %v5748_v51 }
 0x46c   : > { %4209 = vmatmul.mubr.bf16.vlgmr.msra.gmra.mxu0 %v6990_v2 }
 0x46d   : > { %4249 = vmatmul.mubr.bf16.vlgmr.msra.gmra.mxu1 %v6992_v3 }
 0x48c   : > { %v3964_v56 = vpop.f32.mrf.mxu0  ;;  %v4005_v57 = vpop.f32.mrf.mxu1 }
 0x48d   : > { %v3965_v58 = vadd.f32 %v3964_v56, %v2746_v54 }
 0x48e   : > { %v3966_v59 = vpop.f32.mrf.mxu0  ;;  %v4007_v60 = vpop.f32.mrf.mxu1 }
 0x48f   : > { %v4006_v61 = vadd.f32 %v4005_v57, %v3965_v58  ;;  %v3967_v2 = vadd.f32 %v3966_v59, %v2750_v55 }
 0x490   : > { %v3968_v0 = vpop.f32.mrf.mxu0  ;;  %v4009_v3 = vpop.f32.mrf.mxu1 }
 0x491   : > { %v4256_v1 = vsub.f32 0.0, %v4006_v61  ;;  %v4008_v16 = vadd.f32 %v4007_v60, %v3967_v2 }
 0x492   : > { %v3969_v4 = vpop.f32.mrf.mxu0  ;;  %v4010_v7 = vpop.f32.mrf.mxu1 }
 0x493   : > { %v4263_v11 = vmul.f32 1.442695, %v4256_v1  ;;  %v4257_v12 = vsub.f32 0.0, %v4008_v16 }
 0x495   : > { %5751 = vpow2.f32 %v4263_v11  ;;  %v4265_v6 = vmul.f32 1.442695, %v4257_v12 }
 0x497   : > { %5753 = vpow2.f32 %v4265_v6 }
 0x4a2   : > { %v5752_v10 = vpop.eup %5751 }
 0x4a3   : > { %v4277_v13 = vadd.f32 1.0, %v5752_v10 }
 0x4a4   : > { %v5754_v14 = vpop.eup %5753 }
 0x4a5   : > { %v4278_v15 = vadd.f32 1.0, %v5754_v14  ;;  %5755 = vrcp.f32 %v4277_v13 }
 0x4a7   : > { %5757 = vrcp.f32 %v4278_v15 }
 0x4b2   : > { %v5756_v17 = vpop.eup %5755 }
 0x4b4   : > { %v5758_v18 = vpop.eup %5757 }
 0x4b5   : > { %v4952_v21 = vpack.c.bf16 %v5758_v18, %v5756_v17 }
 0x4b7   : > { %4327 = vst [vmem:[%s7488_s15] sm:$0xff] %v4952_v21 }
 0x4cc   : > { %v4046_v24 = vpop.f32.mrf.mxu0  ;;  %v4087_v25 = vpop.f32.mrf.mxu1 }
 0x4cd   : > { %v4047_v26 = vadd.f32 %v4046_v24, %v2754_v22 }
 0x4ce   : > { %v4048_v27 = vpop.f32.mrf.mxu0  ;;  %v4089_v28 = vpop.f32.mrf.mxu1 }
 0x4cf   : > { %v4088_v29 = vadd.f32 %v4087_v25, %v4047_v26  ;;  %v4049_v30 = vadd.f32 %v4048_v27, %v2758_v23 }
 0x4d0   : > { %v4050_v9 = vpop.f32.mrf.mxu0  ;;  %v4091_v31 = vpop.f32.mrf.mxu1 }
 0x4d1   : > { %v4258_v32 = vsub.f32 0.0, %v4088_v29  ;;  %v4090_v52 = vadd.f32 %v4089_v28, %v4049_v30 }
 0x4d2   : > { %v4051_v62 = vpop.f32.mrf.mxu0  ;;  %v4092_v20 = vpop.f32.mrf.mxu1 }
 0x4d3   : > { %v4267_v19 = vmul.f32 1.442695, %v4258_v32  ;;  %v4259_v63 = vsub.f32 0.0, %v4090_v52 }
 0x4d5   : > { %5759 = vpow2.f32 %v4267_v19  ;;  %v4269_v33 = vmul.f32 1.442695, %v4259_v63 }
 0x4d7   : > { %5761 = vpow2.f32 %v4269_v33 }
 0x4d8   : > { %5792 = shalt.err (!%p5789_p3)
}
 0x4d9   : > { %s5793_s24 = scalar_lea.hbm %s4364_s29, 128  ;;  %s5797_s23 = scalar_lea.hbm %s7568_s11, 256 }
 0x4da   : > { %p5794_p4 = scmp.ne.s32.totalorder %s4364_s29, %s5793_s24  ;;  %p5798_p9 = scmp.lt.s32.totalorder %s4364_s29, %s7568_s11 }
 0x4db   : > { %p5799_p10 = scmp.lt.s32.totalorder %s5797_s23, %s5793_s24 }
 0x4dc   : > { %p5795_p7 = pnand %p5794_p4, %p5973_p5 }
 0x4dd   : > { %p5800_p11 = por %p5799_p10, %p5798_p9 }
 0x4de   : > { %p5796_p8 = pneg %p5795_p7 }
 0x4e0   : > { %p5801_p12 = pnand %p5800_p11, %p5796_p8 }
 0x4e2   : > { %5804 = shalt.err (!%p5801_p12)
}
 0x4e3   : > { %5048 = dma.vmem_to_hbm [thread:$0]  (%p5973_p5), %s4367_s25, 128, %s4364_s29, %s4339_s30   ;;  %v5760_v34 = vpop.eup %5759  ;;  %v2761_v40 = vsub.s32 4, %v6716_v5  ;;  %v2765_v41 = vsub.s32 5, %v6716_v5  ;;  %v2769_v16 = vsub.s32 6, %v6716_v5  ;;  %vm4330_vm3 = vcmask 125952  }
 0x4e4   : > { %v4279_v35 = vadd.f32 1.0, %v5760_v34  ;;  %v5762_v8 = vpop.eup %5761  ;;  %s5046_s0 = smul.u32 448, %s5956_s21  ;;  %s4353_s1 = sshll.u32 %s7488_s15, 4  ;;  %s4354_s1 = int_to_ptr.vmem [resolvable:$true] %s4353_s1 }
 0x4e5   : > { %v4280_v37 = vadd.f32 1.0, %v5762_v8  ;;  %v2762_v42 = vrot.slane %v7481_v53, %v2761_v40  ;;  %v2766_v43 = vrot.slane %v7481_v53, %v2765_v41  ;;  %v2770_v11 = vrot.slane %v7481_v53, %v2769_v16  ;;  %s4334_s12 = scalar_lea.sflag [#allocation3], %s6748_s16  ;;  %s5805_s26 = scalar_lea.vmem %s4354_s1, 448 }
 0x4e6   : > { %5763 = vrcp.f32 %v4279_v35  ;;  %s4351_s30 = scalar_lea.hbm %s7567_s10, %s5046_s0  ;;  %p5806_p13 = scmp.ne.s32.totalorder %s4354_s1, %s5805_s26 }
 0x4e7   : > { %5765 = vrcp.f32 %v4280_v37  ;;  %s5874_s13 = smov [#allocation2]  }
 0x4e8   : > { %p5807_p0 = pnand %p5806_p13, %p5973_p5  ;;  %s5809_s14 = sshll.u32 %s5874_s13, 4  ;;  %s5810_s14 = int_to_ptr.vmem [resolvable:$false] %s5809_s14 }
 0x4e9   : > { %s5811_s21 = scalar_lea.vmem %s5810_s14, 896  ;;  %p5812_p2 = scmp.lt.s32.totalorder %s4354_s1, %s5810_s14 }
 0x4ea   : > { %p5808_p1 = pneg %p5807_p0  ;;  %p5813_p3 = scmp.lt.s32.totalorder %s5811_s21, %s5805_s26 }
 0x4ec   : > { %p5814_p4 = por %p5813_p3, %p5812_p2 }
 0x4ee   : > { %p5815_p7 = pnand %p5814_p4, %p5808_p1 }
 0x4f3   : > { %v5764_v38 = vpop.eup %5763 }
 0x4f4   : > { %v5766_v39 = vpop.eup %5765 }
 0x4f5   : > { %v4953_v36 = vpack.c.bf16 %v5766_v39, %v5764_v38 }
 0x4f7   : > { %4328 = vst [vmem:[%s7488_s15 + $0x8] sm:$0xff] %v4953_v36 }
 0x50c   : > { %v4128_v44 = vpop.f32.mrf.mxu0 }
 0x50d   : > { %v4129_v45 = vadd.f32 %v4128_v44, %v2762_v42  ;;  %v4169_v46 = vpop.f32.mrf.mxu1 }
 0x50e   : > { %v4130_v47 = vpop.f32.mrf.mxu0 }
 0x50f   : > { %v4170_v48 = vadd.f32 %v4169_v46, %v4129_v45  ;;  %v4131_v49 = vadd.f32 %v4130_v47, %v2766_v43  ;;  %v4171_v50 = vpop.f32.mrf.mxu1 }
 0x510   : > { %v4132_v51 = vpop.f32.mrf.mxu0 }
 0x511   : > { %v4260_v54 = vsub.f32 0.0, %v4170_v48  ;;  %v4172_v55 = vadd.f32 %v4171_v50, %v4131_v49  ;;  %v4173_v56 = vpop.f32.mrf.mxu1 }
 0x512   : > { %v4133_v57 = vpop.f32.mrf.mxu0 }
 0x513   : > { %v4271_v58 = vmul.f32 1.442695, %v4260_v54  ;;  %v4261_v59 = vsub.f32 0.0, %v4172_v55  ;;  %v4174_v60 = vpop.f32.mrf.mxu1 }
 0x515   : > { %5767 = vpow2.f32 %v4271_v58  ;;  %v4273_v61 = vmul.f32 1.442695, %v4261_v59 }
 0x517   : > { %5769 = vpow2.f32 %v4273_v61 }
 0x522   : > { %v5768_v2 = vpop.eup %5767 }
 0x523   : > { %v4281_v0 = vadd.f32 1.0, %v5768_v2 }
 0x524   : > { %v5770_v3 = vpop.eup %5769 }
 0x525   : > { %v4282_v1 = vadd.f32 1.0, %v5770_v3  ;;  %5771 = vrcp.f32 %v4281_v0 }
 0x527   : > { %5773 = vrcp.f32 %v4282_v1 }
 0x52c   : > { %v5016_v4 = vpop.f32.mrf.mxu0 }
 0x52d   : > { %v5038_v7 = vpop.f32.mrf.mxu1 }
 0x52e   : > { %v5017_v12 = vpop.f32.mrf.mxu0 }
 0x52f   : > { %v5018_v6 = vadd.f32 %v5017_v12, %v5016_v4  ;;  %v5039_v10 = vpop.f32.mrf.mxu1 }
 0x530   : > { %v5019_v13 = vpop.f32.mrf.mxu0  ;;  %v5040_v15 = vadd.f32 %v5039_v10, %v5038_v7 }
 0x531   : > { %v4211_v14 = vadd.f32 %v5018_v6, %v2770_v11  ;;  %v5041_v17 = vpop.f32.mrf.mxu1 }
 0x532   : > { %v5020_v18 = vpop.f32.mrf.mxu0  ;;  %v5772_v21 = vpop.eup %5771 }
 0x533   : > { %v4251_v22 = vadd.f32 %v5040_v15, %v4211_v14  ;;  %v5042_v23 = vpop.f32.mrf.mxu1 }
 0x534   : > { %v5774_v24 = vpop.eup %5773 }
 0x535   : > { %v4262_v5 = vsub.f32 0.0, %v4251_v22  ;;  %v4954_v25 = vpack.c.bf16 %v5774_v24, %v5772_v21 }
 0x537   : > { %v4275_v53 = vmul.f32 1.442695, %v4262_v5  ;;  %4329 = vst [vmem:[%s7488_s15 + $0x10] sm:$0xff] %v4954_v25 }
 0x539   : > { %5775 = vpow2.f32 %v4275_v53 }
 0x546   : > { %v5776_v26 = vpop.eup %5775 }
 0x547   : > { %v4283_v27 = vadd.f32 1.0, %v5776_v26 }
 0x549   : > { %5777 = vrcp.f32 %v4283_v27 }
 0x556   : > { %v5778_v28 = vpop.eup %5777 }
 0x557   : > { %v4955_v29 = vpack.c.bf16 %v5778_v28, %v5778_v28 }
 0x559   : > { %4331 = vst.msk [vmem:[%s7488_s15 + $0x18] sm:$0xf] %vm4330_vm3, %v4955_v29 }
 0x55a   : > { %5818 = shalt.err (!%p5815_p7)
}
 0x55b   : > { %s5819_s24 = scalar_lea.hbm %s4351_s30, 448  ;;  %s5823_s19 = scalar_lea.hbm %s7567_s10, 896 }
 0x55c   : > { %p5820_p8 = scmp.ne.s32.totalorder %s4351_s30, %s5819_s24  ;;  %p5824_p11 = scmp.lt.s32.totalorder %s4351_s30, %s7567_s10 }
 0x55d   : > { %p5825_p12 = scmp.lt.s32.totalorder %s5823_s19, %s5819_s24 }
 0x55e   : > { %p5821_p9 = pnand %p5820_p8, %p5973_p5 }
 0x55f   : > { %p5826_p13 = por %p5825_p12, %p5824_p11 }
 0x560   : > { %p5822_p10 = pneg %p5821_p9 }
 0x562   : > { %p5827_p0 = pnand %p5826_p13, %p5822_p10 }
 0x564   : > { %5830 = shalt.err (!%p5827_p0)
}
 0x565   : > { %5047 = dma.vmem_to_hbm [thread:$0]  (%p5973_p5), %s4354_s1, 448, %s4351_s30, %s4334_s12  }
 0x566 PF: > { %p5058_p1 = scmp.ge.s32.totalorder %s5869_s20, 2  ;;  %s4378_s0 = sand.u32 1, %s5857_s17  }
 0x567   : > { %s4379_s25 = scalar_lea.sflag [#allocation3], %s4378_s0 }
 0x568   : > { %p5052_p2 = pnand %p5058_p1, %p5977_p6 }
 0x56a   : > { %p5053_p3 = pneg %p5052_p2 }
 0x56c   : > { %5848 = dma.done.wait (%p5053_p3), %s4379_s25, 448  }
 0x56d   : > { %5850 = vsyncadd (%p5053_p3), %s4379_s25, 4294966848  ;;  %s4388_s29 = scalar_lea.sflag [#allocation5], %s4378_s0 }
 0x56e   : > { %5852 = dma.done.wait (%p5053_p3), %s4388_s29, 128  }
 0x56f   : > { %5854 = vsyncadd (%p5053_p3), %s4388_s29, 4294967168  ;;  %s7581_s20 = sld [smem:[#allocation9_spill]]  ;;  %s7584_s17 = smov %s5861_s18 }
 0x570   : > { %s7582_s26 = sld [smem:[#allocation8_spill]] }
 0x571   : > { %s7583_s19 = sld [smem:[#allocation10_spill]] }
 0x575   : > { %p25_p5 = scmp.ge.s32.totalorder %s7581_s20, 4  }
 0x576   : > { %s7585_s18 = smov %s7582_s26 }
 0x577   :  { %27 = sbr.rel (!%p25_p5) target bundleno = 8 (0x8), region = 115 }
 0x57c   :  { %4393 = vsyncpa [#allocation3], 1 }
 0x57d   :  { %4395 = vsyncpa [#allocation3 + $0x1], 1 }
 0x57e   :  { %4396 = vsyncpa [#allocation5], 1 }
 0x57f   :  { %4398 = vsyncpa [#allocation5 + $0x1], 1 }

</bundles_post_ra>
